<compile_context>
chip_gen: v6e
topology: v6e:2x2x1
jax: 0.10.0
libtpu: 0.0.40
codegen_flags: <defaults>
</compile_context>

<pallas_src>
import functools

import jax
import jax.numpy as jnp
from jax.experimental import pallas as pl
from jax.experimental.pallas import tpu as pltpu


def _round_up(x, m):
    return ((x + m - 1) // m) * m


def _pick_row_block(H, W, Cb, Cout, mm_bytes):
    """Rows per inner block: keep the live set of the conv stage (z slab in the
    matmul dtype, (RBW, 3*Cout) f32 accumulator, (RBW, Cout) output) inside the
    64 x 4 KiB vreg file with headroom."""
    budget = 128 * 1024
    per_row = W * (2 * mm_bytes * Cb + 4 * (3 * Cout) + 8 * Cout)
    rb = max(1, min(H, budget // max(per_row, 1)))
    while H % rb:                              # must divide H exactly
        rb -= 1
    return rb


# ----------------------------------------------------------------------------
# Fused kernel: one image per grid step.
# ----------------------------------------------------------------------------
def dense_layer_kernel(*refs, n_feat, H, W, RB, pad):
    """refs layout:
         x_f        (H*W, Ci_f)      for f in range(n_feat)
         s1_f, t1_f (1, Ci_f)        BN1 scale/shift split per feature
         w1_f       (Ci_f, Cb)       1x1 conv weights (BN2 folded), per feature
         b1         (1, Cb)          1x1 bias (BN2 folded)
         w3r        (3, Cb, 3*Cout)  3x3 weights repacked per kernel row
         b3         (1, Cout)
         o          (H*W, Cout)      output
         zsc        (H*W + 2*pad, Cb) scratch: z with zero halo rows
    """
    x_refs = refs[0:n_feat]
    s1_refs = refs[n_feat:2 * n_feat]
    t1_refs = refs[2 * n_feat:3 * n_feat]
    w1_refs = refs[3 * n_feat:4 * n_feat]
    b1_ref, w3_ref, b3_ref = refs[4 * n_feat:4 * n_feat + 3]
    o_ref = refs[4 * n_feat + 3]
    zsc_ref = refs[4 * n_feat + 4]

    HW = H * W
    RBW = RB * W
    n_rb = H // RB
    Cb = zsc_ref.shape[-1]
    Cout = o_ref.shape[-1]
    mm_dtype = w3_ref.dtype

    # Zero halo rows (rows "-1" and "H" of z in padded coordinates).  Done every
    # grid step on purpose: per-core scratch + megacore "parallel" sharding
    # means a program_id==0 guard would skip initialization on the 2nd core.
    zsc_ref[pl.ds(0, pad), :] = jnp.zeros((pad, Cb), zsc_ref.dtype)
    zsc_ref[pl.ds(pad + HW, pad), :] = jnp.zeros((pad, Cb), zsc_ref.dtype)

    # Hoist all loop-invariant loads (JAX does not CSE these inside loops).
    s1 = [s1_refs[f][...] for f in range(n_feat)]
    t1 = [t1_refs[f][...] for f in range(n_feat)]
    w1 = [w1_refs[f][...] for f in range(n_feat)]
    b1 = b1_ref[...]
    b3 = b3_ref[...]
    w3_rows = [w3_ref[k] for k in range(3)]            # 3 x (Cb, 3*Cout)

    # Column masks for the +/-1 width shifts.  Blocks are image-row aligned,
    # so one (RBW, 1) mask serves every block (hoisted).
    col = jax.lax.broadcasted_iota(jnp.int32, (RBW, 1), 0) % W
    mask_l = (col >= 1).astype(jnp.float32)            # dw = -1 invalid at c == 0
    mask_r = (col <= W - 2).astype(jnp.float32)        # dw = +1 invalid at c == W-1

    # ---- stage 1: BN1 + ReLU + 1x1 conv (BN2 folded) + ReLU -> z scratch ----
    # Per-feature accumulation == the concatenated matmul (no HBM concat).
    def bottleneck_block(off):
        acc1 = jnp.zeros((RBW, Cb), jnp.float32)
        for f in range(n_feat):
            xb = x_refs[f][pl.ds(off, RBW), :].astype(jnp.float32)
            hb = jnp.maximum(xb * s1[f] + t1[f], 0.0).astype(mm_dtype)  # BN1+ReLU
            acc1 = acc1 + jnp.dot(hb, w1[f], preferred_element_type=jnp.float32)
        zsc_ref[pl.ds(pad + off, RBW), :] = jnp.maximum(
            acc1 + b1, 0.0).astype(zsc_ref.dtype)                       # (+BN2)+ReLU

    # ---- stage 2: 3x3 conv (pad=1) from the VMEM-resident z -----------------
    def conv_block(off):
        acc3 = jnp.zeros((RBW, 3 * Cout), jnp.float32)
        for k, dh in enumerate((-1, 0, 1)):
            # Contiguous row slab = z shifted by dh rows (image-edge rows fall
            # into the zero halo regions).  One wide matmul per dh.
            slab = zsc_ref[pl.ds(pad + off + dh * W, RBW), :]
            acc3 = acc3 + jnp.dot(slab, w3_rows[k],
                                  preferred_element_type=jnp.float32)
        # Column groups: [0:Cout]=dw=-1 tap, [Cout:2Cout]=dw=0, [2Cout:]=dw=+1.
        left = jnp.roll(acc3[:, 0:Cout], 1, axis=0)      # out[i] += y_left[i-1]
        right = jnp.roll(acc3[:, 2 * Cout:3 * Cout], -1, axis=0)
        out = acc3[:, Cout:2 * Cout] + mask_l * left + mask_r * right + b3
        # TODO(synk): masked vst here (Cout < 128); lane-dense repack skipped.
        o_ref[pl.ds(off, RBW), :] = out.astype(o_ref.dtype)

    # ---- software-pipelined interleave: z[b+2] while conv runs block b ------
    n_pre = min(2, n_rb)
    for b in range(n_pre):
        bottleneck_block(b * RBW)

    if n_rb <= 8:
        # Short, fixed trip count: unroll statically.
        for b in range(n_rb):
            if b + 2 < n_rb:
                bottleneck_block((b + 2) * RBW)
            conv_block(b * RBW)
    else:
        aligned = (RBW % 8) == 0

        def _tag(v):
            return pl.multiple_of(v, 8) if aligned else v

        def body(b, carry):
            @pl.when(b + 2 < n_rb)
            def _():
                bottleneck_block(_tag((b + 2) * RBW))
            conv_block(_tag(b * RBW))
            return carry

        jax.lax.fori_loop(0, n_rb, body, 0, unroll=2)


# ----------------------------------------------------------------------------
# pallas_call wrapper
# ----------------------------------------------------------------------------
def dense_layer_pallas(x_feats, s1_list, t1_list, w1_list, b1f, w3r, b3, *, H, W):
    N, HW, _ = x_feats[0].shape
    n_feat = len(x_feats)
    Cb = b1f.shape[-1]
    Cout = b3.shape[-1]
    mm_dtype = w3r.dtype
    mm_bytes = jnp.dtype(mm_dtype).itemsize
    RB = _pick_row_block(H, W, Cb, Cout, mm_bytes)
    pad = _round_up(max(W, 8), 8)          # halo rows (>= W, 8-aligned)

    kern = functools.partial(dense_layer_kernel,
                             n_feat=n_feat, H=H, W=W, RB=RB, pad=pad)

    in_specs = []
    for xf in x_feats:
        in_specs.append(pl.BlockSpec((None, HW, xf.shape[-1]), lambda n: (n, 0, 0)))
    for s in s1_list:
        in_specs.append(pl.BlockSpec((1, s.shape[-1]), lambda n: (0, 0)))
    for t in t1_list:
        in_specs.append(pl.BlockSpec((1, t.shape[-1]), lambda n: (0, 0)))
    for w in w1_list:
        in_specs.append(pl.BlockSpec(w.shape, lambda n: (0, 0)))
    in_specs += [
        pl.BlockSpec((1, Cb), lambda n: (0, 0)),
        pl.BlockSpec((3, Cb, 3 * Cout), lambda n: (0, 0, 0)),
        pl.BlockSpec((1, Cout), lambda n: (0, 0)),
    ]

    # Explicit VMEM budget (v7x: 64 MiB physical / 32 MiB default scoped).
    in_bytes = sum(HW * xf.shape[-1] * xf.dtype.itemsize for xf in x_feats) * 2
    w_bytes = (sum(int(w.size) * w.dtype.itemsize for w in w1_list)
               + int(w3r.size) * w3r.dtype.itemsize
               + int(b1f.size) * 4 + int(b3.size) * 4) * 2
    out_bytes = HW * Cout * 4 * 2
    scratch_bytes = (HW + 2 * pad) * Cb * mm_bytes
    need = in_bytes + w_bytes + out_bytes + scratch_bytes + (2 << 20)
    vmem_limit = int(min(128 << 20, max(need, 32 << 20)))

    Cin = sum(xf.shape[-1] for xf in x_feats)
    flops = 2 * N * HW * (Cin * Cb + 3 * Cb * 3 * Cout)
    bytes_accessed = (sum(int(xf.size) * xf.dtype.itemsize for xf in x_feats)
                      + N * HW * Cout * 4
                      + int(w3r.size) * w3r.dtype.itemsize
                      + sum(int(w.size) * w.dtype.itemsize for w in w1_list))
    cost = pl.CostEstimate(flops=flops, transcendentals=0,
                           bytes_accessed=bytes_accessed)

    out_flat = pl.pallas_call(
        kern,
        out_shape=jax.ShapeDtypeStruct((N, HW, Cout), jnp.float32),
        grid_spec=pltpu.PrefetchScalarGridSpec(
            num_scalar_prefetch=0,
            grid=(N,),
            in_specs=in_specs,
            out_specs=pl.BlockSpec((None, HW, Cout), lambda n: (n, 0, 0)),
            scratch_shapes=[pltpu.VMEM((HW + 2 * pad, Cb), mm_dtype)],
        ),
        compiler_params=pltpu.CompilerParams(
            dimension_semantics=("parallel",),
            vmem_limit_bytes=vmem_limit),
        cost_estimate=cost,
    )(*x_feats, *s1_list, *t1_list, *w1_list, b1f, w3r, b3)
    return out_flat


# ----------------------------------------------------------------------------
# DenseLayer forward (accepts NCHW prev_features, like the PyTorch module).
# ----------------------------------------------------------------------------
def dense_layer_forward(prev_features_nchw, params, *, matmul_dtype=jnp.float32):
    eps = 1e-5
    s1 = params["bn1_gamma"] / jnp.sqrt(params["bn1_var"] + eps)
    t1 = params["bn1_beta"] - params["bn1_mean"] * s1
    s2 = params["bn2_gamma"] / jnp.sqrt(params["bn2_var"] + eps)
    t2 = params["bn2_beta"] - params["bn2_mean"] * s2

    # Fold BN2 into the 1x1 conv: (x@w1 + b1)*s2 + t2 == x@(w1*s2) + (b1*s2 + t2)
    w1f = (params["w1"] * s2[None, :]).astype(matmul_dtype)
    b1f = (params["b1"] * s2 + t2).astype(jnp.float32).reshape(1, -1)

    Cb = params["w1"].shape[1]
    Cout = params["w3"].shape[-1]
    # Per-row weight repack: (3, Cb, 3*Cout), column group kw*Cout:(kw+1)*Cout
    # holds the (kh, kw) tap -> ONE wide matmul per dh inside the kernel.
    w3r = jnp.transpose(params["w3"], (0, 2, 1, 3)).reshape(3, Cb, 3 * Cout)
    w3r = w3r.astype(matmul_dtype)
    b3 = params["b3"].astype(jnp.float32).reshape(1, -1)

    use_bf16 = jnp.dtype(matmul_dtype) == jnp.dtype(jnp.bfloat16)
    in_dtype = jnp.bfloat16 if use_bf16 else jnp.float32

    # NCHW -> (N, H*W, Ci) per feature (glue); the Cin concat happens inside
    # the kernel by per-feature matmul accumulation (no HBM concatenate).
    # TODO(synk): a full NHWC DenseNet would keep activations channel-last
    #             end-to-end and drop these transposes entirely.
    N, _, H, W = prev_features_nchw[0].shape
    x_feats, s1_list, t1_list, w1_list = [], [], [], []
    c0 = 0
    for f in prev_features_nchw:
        ci = f.shape[1]
        x_feats.append(jnp.transpose(f, (0, 2, 3, 1))
                       .reshape(N, H * W, ci).astype(in_dtype))
        s1_list.append(s1[c0:c0 + ci].astype(jnp.float32).reshape(1, ci))
        t1_list.append(t1[c0:c0 + ci].astype(jnp.float32).reshape(1, ci))
        w1_list.append(w1f[c0:c0 + ci, :])
        c0 += ci

    out_flat = dense_layer_pallas(x_feats, s1_list, t1_list, w1_list,
                                  b1f, w3r, b3, H=H, W=W)
    out_nhwc = out_flat.reshape(N, H, W, Cout)
    return jnp.transpose(out_nhwc, (0, 3, 1, 2))       # back to NCHW


# ----------------------------------------------------------------------------
# Pure-JAX reference (for correctness check)
# ----------------------------------------------------------------------------
def reference_forward(prev_features_nchw, params):
    eps = 1e-5
    x = jnp.concatenate(prev_features_nchw, axis=1)
    s1 = params["bn1_gamma"] / jnp.sqrt(params["bn1_var"] + eps)
    t1 = params["bn1_beta"] - params["bn1_mean"] * s1
    h = jnp.maximum(x * s1[None, :, None, None] + t1[None, :, None, None], 0.0)
    w1_oihw = jnp.transpose(params["w1"], (1, 0))[:, :, None, None]
    y = jax.lax.conv_general_dilated(h, w1_oihw, (1, 1), "VALID",
                                     dimension_numbers=("NCHW", "OIHW", "NCHW"))
    y = y + params["b1"][None, :, None, None]
    s2 = params["bn2_gamma"] / jnp.sqrt(params["bn2_var"] + eps)
    t2 = params["bn2_beta"] - params["bn2_mean"] * s2
    z = jnp.maximum(y * s2[None, :, None, None] + t2[None, :, None, None], 0.0)
    w3_oihw = jnp.transpose(params["w3"], (3, 2, 0, 1))
    out = jax.lax.conv_general_dilated(z, w3_oihw, (1, 1), ((1, 1), (1, 1)),
                                       dimension_numbers=("NCHW", "OIHW", "NCHW"))
    return out + params["b3"][None, :, None, None]


# ----------------------------------------------------------------------------
if __name__ == "__main__":
    # small shapes: two prev features of 2 channels each -> in_channels=4
    N, H, W = 2, 16, 16
    in_channels, bottleneck_size, growth_rate = 4, 8, 4

    key = jax.random.PRNGKey(0)
    keys = jax.random.split(key, 12)

    f0 = jax.random.normal(keys[0], (N, 2, H, W), jnp.float32)
    f1 = jax.random.normal(keys[1], (N, 2, H, W), jnp.float32)

    params = {
        "bn1_gamma": 1.0 + 0.1 * jax.random.normal(keys[2], (in_channels,)),
        "bn1_beta": 0.1 * jax.random.normal(keys[3], (in_channels,)),
        "bn1_mean": 0.05 * jax.random.normal(keys[4], (in_channels,)),
        "bn1_var": jnp.abs(1.0 + 0.1 * jax.random.normal(keys[5], (in_channels,))),
        "w1": 0.2 * jax.random.normal(keys[6], (in_channels, bottleneck_size)),
        "b1": 0.05 * jax.random.normal(keys[7], (bottleneck_size,)),
        "bn2_gamma": 1.0 + 0.1 * jax.random.normal(keys[8], (bottleneck_size,)),
        "bn2_beta": 0.1 * jax.random.normal(keys[9], (bottleneck_size,)),
        "bn2_mean": jnp.zeros((bottleneck_size,), jnp.float32),
        "bn2_var": jnp.ones((bottleneck_size,), jnp.float32),
        "w3": 0.1 * jax.random.normal(keys[10], (3, 3, bottleneck_size, growth_rate)),
        "b3": 0.05 * jax.random.normal(keys[11], (growth_rate,)),
    }
    params = {k: v.astype(jnp.float32) for k, v in params.items()}

    ref = jax.block_until_ready(reference_forward([f0, f1], params))

    # f32 matmul-operand path (tight check vs reference).
    out = jax.block_until_ready(dense_layer_forward([f0, f1], params))
    assert out.shape == (N, growth_rate, H, W), out.shape
    assert jnp.allclose(out, ref, atol=1e-4, rtol=1e-4), \
        float(jnp.max(jnp.abs(out - ref)))

    # bf16 path (bf16 inputs, bf16 z scratch, bf16 matmul operands) -> looser tol.
    out_bf16 = jax.block_until_ready(
        dense_layer_forward([f0, f1], params, matmul_dtype=jnp.bfloat16))
    assert out_bf16.shape == (N, growth_rate, H, W), out_bf16.shape
    assert jnp.allclose(out_bf16, ref, atol=5e-2, rtol=5e-2), \
        float(jnp.max(jnp.abs(out_bf16 - ref)))

    print("KERNEL_OK")
</pallas_src>

<mosaic_0001>
module attributes {stable_mosaic.version = 11 : i64} {
  func.func @dense_layer_kernel(%arg0: i32, %arg1: memref<1x256x2xf32, #tpu.memory_space<vmem>>, %arg2: memref<1x256x2xf32, #tpu.memory_space<vmem>>, %arg3: memref<1x2xf32, #tpu.memory_space<vmem>>, %arg4: memref<1x2xf32, #tpu.memory_space<vmem>>, %arg5: memref<1x2xf32, #tpu.memory_space<vmem>>, %arg6: memref<1x2xf32, #tpu.memory_space<vmem>>, %arg7: memref<2x8xf32, #tpu.memory_space<vmem>>, %arg8: memref<2x8xf32, #tpu.memory_space<vmem>>, %arg9: memref<1x8xf32, #tpu.memory_space<vmem>>, %arg10: memref<3x8x12xf32, #tpu.memory_space<vmem>>, %arg11: memref<1x4xf32, #tpu.memory_space<vmem>>, %arg12: memref<1x256x4xf32, #tpu.memory_space<vmem>>, %arg13: memref<288x8xf32, #tpu.memory_space<vmem>>) attributes {dimension_semantics = [#tpu.dimension_semantics<parallel>], iteration_bounds = array<i64: 2>, scalar_prefetch = 0 : i64, scratch_operands = 1 : i64, tpu.core_type = #tpu.core_type<tc>, window_params = [{transform_indices = @transform_0, window_bounds = array<i64: 1, 256, 2>}, {transform_indices = @transform_1, window_bounds = array<i64: 1, 256, 2>}, {pipeline_mode = #tpu.pipeline_mode<synchronous>, transform_indices = @transform_2, window_bounds = array<i64: 1, 2>}, {pipeline_mode = #tpu.pipeline_mode<synchronous>, transform_indices = @transform_3, window_bounds = array<i64: 1, 2>}, {pipeline_mode = #tpu.pipeline_mode<synchronous>, transform_indices = @transform_4, window_bounds = array<i64: 1, 2>}, {pipeline_mode = #tpu.pipeline_mode<synchronous>, transform_indices = @transform_5, window_bounds = array<i64: 1, 2>}, {pipeline_mode = #tpu.pipeline_mode<synchronous>, transform_indices = @transform_6, window_bounds = array<i64: 2, 8>}, {pipeline_mode = #tpu.pipeline_mode<synchronous>, transform_indices = @transform_7, window_bounds = array<i64: 2, 8>}, {pipeline_mode = #tpu.pipeline_mode<synchronous>, transform_indices = @transform_8, window_bounds = array<i64: 1, 8>}, {pipeline_mode = #tpu.pipeline_mode<synchronous>, transform_indices = @transform_9, window_bounds = array<i64: 3, 8, 12>}, {pipeline_mode = #tpu.pipeline_mode<synchronous>, transform_indices = @transform_10, window_bounds = array<i64: 1, 4>}, {transform_indices = @transform_11, window_bounds = array<i64: 1, 256, 4>}]} {
    %cst = arith.constant 0.000000e+00 : f32
    %0 = vector.broadcast %cst : f32 to vector<16x8xf32>
    %c0 = arith.constant 0 : index
    %c0_0 = arith.constant 0 : index
    %1 = vector.load %arg13[%c0, %c0_0] : memref<288x8xf32, #tpu.memory_space<vmem>>, vector<16x8xf32>
    tpu.vector_store %arg13[%c0, %c0_0], %0 {strides = array<i32>} : memref<288x8xf32, #tpu.memory_space<vmem>>, vector<16x8xf32>,
    %cst_1 = arith.constant 0.000000e+00 : f32
    %2 = vector.broadcast %cst_1 : f32 to vector<16x8xf32>
    %c272 = arith.constant 272 : index
    %c0_2 = arith.constant 0 : index
    %3 = vector.load %arg13[%c272, %c0_2] : memref<288x8xf32, #tpu.memory_space<vmem>>, vector<16x8xf32>
    tpu.vector_store %arg13[%c272, %c0_2], %2 {strides = array<i32>} : memref<288x8xf32, #tpu.memory_space<vmem>>, vector<16x8xf32>,
    %c0_3 = arith.constant 0 : index
    %c0_4 = arith.constant 0 : index
    %4 = vector.load %arg3[%c0_3, %c0_4] : memref<1x2xf32, #tpu.memory_space<vmem>>, vector<1x2xf32>
    %c0_5 = arith.constant 0 : index
    %c0_6 = arith.constant 0 : index
    %5 = vector.load %arg4[%c0_5, %c0_6] : memref<1x2xf32, #tpu.memory_space<vmem>>, vector<1x2xf32>
    %c0_7 = arith.constant 0 : index
    %c0_8 = arith.constant 0 : index
    %6 = vector.load %arg5[%c0_7, %c0_8] : memref<1x2xf32, #tpu.memory_space<vmem>>, vector<1x2xf32>
    %c0_9 = arith.constant 0 : index
    %c0_10 = arith.constant 0 : index
    %7 = vector.load %arg6[%c0_9, %c0_10] : memref<1x2xf32, #tpu.memory_space<vmem>>, vector<1x2xf32>
    %c0_11 = arith.constant 0 : index
    %c0_12 = arith.constant 0 : index
    %8 = vector.load %arg7[%c0_11, %c0_12] : memref<2x8xf32, #tpu.memory_space<vmem>>, vector<2x8xf32>
    %c0_13 = arith.constant 0 : index
    %c0_14 = arith.constant 0 : index
    %9 = vector.load %arg8[%c0_13, %c0_14] : memref<2x8xf32, #tpu.memory_space<vmem>>, vector<2x8xf32>
    %c0_15 = arith.constant 0 : index
    %c0_16 = arith.constant 0 : index
    %10 = vector.load %arg9[%c0_15, %c0_16] : memref<1x8xf32, #tpu.memory_space<vmem>>, vector<1x8xf32>
    %c0_17 = arith.constant 0 : index
    %c0_18 = arith.constant 0 : index
    %11 = vector.load %arg11[%c0_17, %c0_18] : memref<1x4xf32, #tpu.memory_space<vmem>>, vector<1x4xf32>
    %c0_19 = arith.constant 0 : index
    %c0_20 = arith.constant 0 : index
    %c0_21 = arith.constant 0 : index
    %12 = vector.load %arg10[%c0_19, %c0_20, %c0_21] : memref<3x8x12xf32, #tpu.memory_space<vmem>>, vector<1x8x12xf32>
    %13 = vector.shape_cast %12 : vector<1x8x12xf32> to vector<8x12xf32>
    %c1 = arith.constant 1 : index
    %c0_22 = arith.constant 0 : index
    %c0_23 = arith.constant 0 : index
    %14 = vector.load %arg10[%c1, %c0_22, %c0_23] : memref<3x8x12xf32, #tpu.memory_space<vmem>>, vector<1x8x12xf32>
    %15 = vector.shape_cast %14 : vector<1x8x12xf32> to vector<8x12xf32>
    %c2 = arith.constant 2 : index
    %c0_24 = arith.constant 0 : index
    %c0_25 = arith.constant 0 : index
    %16 = vector.load %arg10[%c2, %c0_24, %c0_25] : memref<3x8x12xf32, #tpu.memory_space<vmem>>, vector<1x8x12xf32>
    %17 = vector.shape_cast %16 : vector<1x8x12xf32> to vector<8x12xf32>
    %18 = tpu.iota {dimensions = array<i32: 0>} : vector<256x1xi32>
    %c16_i32 = arith.constant 16 : i32
    %c0_i32 = arith.constant 0 : i32
    %19 = arith.cmpi eq, %c16_i32, %c0_i32 : i32
    %c1_i32 = arith.constant 1 : i32
    %20 = arith.select %19, %c1_i32, %c16_i32 : i32
    %21 = vector.broadcast %20 : i32 to vector<256x1xi32>
    %22 = arith.remsi %18, %21 : vector<256x1xi32>
    %c0_i32_26 = arith.constant 0 : i32
    %23 = vector.broadcast %c0_i32_26 : i32 to vector<256x1xi32>
    %24 = arith.cmpi ne, %22, %23 : vector<256x1xi32>
    %c0_i32_27 = arith.constant 0 : i32
    %25 = vector.broadcast %c0_i32_27 : i32 to vector<256x1xi32>
    %26 = arith.cmpi slt, %22, %25 : vector<256x1xi32>
    %c0_i32_28 = arith.constant 0 : i32
    %27 = arith.cmpi slt, %20, %c0_i32_28 : i32
    %28 = vector.broadcast %27 : i1 to vector<256x1xi1>
    %29 = vector.broadcast %28 : vector<256x1xi1> to vector<256x1xi1>
    %30 = arith.xori %26, %29 : vector<256x1xi1>
    %31 = arith.andi %30, %24 : vector<256x1xi1>
    %32 = vector.broadcast %20 : i32 to vector<256x1xi32>
    %33 = arith.addi %22, %32 : vector<256x1xi32>
    %34 = arith.select %31, %33, %22 : vector<256x1xi1>, vector<256x1xi32>
    %c1_i32_29 = arith.constant 1 : i32
    %35 = vector.broadcast %c1_i32_29 : i32 to vector<256x1xi32>
    %36 = arith.cmpi sge, %34, %35 : vector<256x1xi32>
    %37 = arith.extui %36 : vector<256x1xi1> to vector<256x1xi32>
    %38 = arith.sitofp %37 : vector<256x1xi32> to vector<256x1xf32>
    %c14_i32 = arith.constant 14 : i32
    %39 = vector.broadcast %c14_i32 : i32 to vector<256x1xi32>
    %40 = arith.cmpi sle, %34, %39 : vector<256x1xi32>
    %41 = arith.extui %40 : vector<256x1xi1> to vector<256x1xi32>
    %42 = arith.sitofp %41 : vector<256x1xi32> to vector<256x1xf32>
    %cst_30 = arith.constant 0.000000e+00 : f32
    %43 = vector.broadcast %cst_30 : f32 to vector<256x8xf32>
    %c0_31 = arith.constant 0 : index
    %c0_32 = arith.constant 0 : index
    %c0_33 = arith.constant 0 : index
    %44 = vector.load %arg1[%c0_31, %c0_32, %c0_33] : memref<1x256x2xf32, #tpu.memory_space<vmem>>, vector<1x256x2xf32>
    %45 = vector.shape_cast %44 : vector<1x256x2xf32> to vector<256x2xf32>
    %46 = vector.broadcast %4 : vector<1x2xf32> to vector<256x2xf32>
    %47 = arith.mulf %45, %46 : vector<256x2xf32>
    %48 = vector.broadcast %6 : vector<1x2xf32> to vector<256x2xf32>
    %49 = arith.addf %47, %48 : vector<256x2xf32>
    %cst_34 = arith.constant 0.000000e+00 : f32
    %50 = vector.broadcast %cst_34 : f32 to vector<256x2xf32>
    %51 = arith.maximumf %49, %50 : vector<256x2xf32>
    %cst_35 = arith.constant dense<0.000000e+00> : vector<256x8xf32>
    %52 = tpu.matmul %51, %8, %cst_35 {dimension_numbers = #tpu.dot_dimension_numbers<[1], [0], [0], [1], [0, 0, 1, 1], [], []>} : vector<256x2xf32>, vector<2x8xf32>, vector<256x8xf32> -> vector<256x8xf32>
    %53 = arith.addf %43, %52 : vector<256x8xf32>
    %c0_36 = arith.constant 0 : index
    %c0_37 = arith.constant 0 : index
    %c0_38 = arith.constant 0 : index
    %54 = vector.load %arg2[%c0_36, %c0_37, %c0_38] : memref<1x256x2xf32, #tpu.memory_space<vmem>>, vector<1x256x2xf32>
    %55 = vector.shape_cast %54 : vector<1x256x2xf32> to vector<256x2xf32>
    %56 = vector.broadcast %5 : vector<1x2xf32> to vector<256x2xf32>
    %57 = arith.mulf %55, %56 : vector<256x2xf32>
    %58 = vector.broadcast %7 : vector<1x2xf32> to vector<256x2xf32>
    %59 = arith.addf %57, %58 : vector<256x2xf32>
    %cst_39 = arith.constant 0.000000e+00 : f32
    %60 = vector.broadcast %cst_39 : f32 to vector<256x2xf32>
    %61 = arith.maximumf %59, %60 : vector<256x2xf32>
    %cst_40 = arith.constant dense<0.000000e+00> : vector<256x8xf32>
    %62 = tpu.matmul %61, %9, %cst_40 {dimension_numbers = #tpu.dot_dimension_numbers<[1], [0], [0], [1], [0, 0, 1, 1], [], []>} : vector<256x2xf32>, vector<2x8xf32>, vector<256x8xf32> -> vector<256x8xf32>
    %63 = arith.addf %53, %62 : vector<256x8xf32>
    %64 = vector.broadcast %10 : vector<1x8xf32> to vector<256x8xf32>
    %65 = arith.addf %63, %64 : vector<256x8xf32>
    %cst_41 = arith.constant 0.000000e+00 : f32
    %66 = vector.broadcast %cst_41 : f32 to vector<256x8xf32>
    %67 = arith.maximumf %65, %66 : vector<256x8xf32>
    %c16 = arith.constant 16 : index
    %c0_42 = arith.constant 0 : index
    %68 = vector.load %arg13[%c16, %c0_42] : memref<288x8xf32, #tpu.memory_space<vmem>>, vector<256x8xf32>
    tpu.vector_store %arg13[%c16, %c0_42], %67 {strides = array<i32>} : memref<288x8xf32, #tpu.memory_space<vmem>>, vector<256x8xf32>,
    %cst_43 = arith.constant 0.000000e+00 : f32
    %69 = vector.broadcast %cst_43 : f32 to vector<256x12xf32>
    %c0_44 = arith.constant 0 : index
    %c0_45 = arith.constant 0 : index
    %70 = vector.load %arg13[%c0_44, %c0_45] : memref<288x8xf32, #tpu.memory_space<vmem>>, vector<256x8xf32>
    %cst_46 = arith.constant dense<0.000000e+00> : vector<256x12xf32>
    %71 = tpu.matmul %70, %13, %cst_46 {dimension_numbers = #tpu.dot_dimension_numbers<[1], [0], [0], [1], [0, 0, 1, 1], [], []>} : vector<256x8xf32>, vector<8x12xf32>, vector<256x12xf32> -> vector<256x12xf32>
    %72 = arith.addf %69, %71 : vector<256x12xf32>
    %c16_47 = arith.constant 16 : index
    %c0_48 = arith.constant 0 : index
    %73 = vector.load %arg13[%c16_47, %c0_48] : memref<288x8xf32, #tpu.memory_space<vmem>>, vector<256x8xf32>
    %cst_49 = arith.constant dense<0.000000e+00> : vector<256x12xf32>
    %74 = tpu.matmul %73, %15, %cst_49 {dimension_numbers = #tpu.dot_dimension_numbers<[1], [0], [0], [1], [0, 0, 1, 1], [], []>} : vector<256x8xf32>, vector<8x12xf32>, vector<256x12xf32> -> vector<256x12xf32>
    %75 = arith.addf %72, %74 : vector<256x12xf32>
    %c32 = arith.constant 32 : index
    %c0_50 = arith.constant 0 : index
    %76 = vector.load %arg13[%c32, %c0_50] : memref<288x8xf32, #tpu.memory_space<vmem>>, vector<256x8xf32>
    %cst_51 = arith.constant dense<0.000000e+00> : vector<256x12xf32>
    %77 = tpu.matmul %76, %17, %cst_51 {dimension_numbers = #tpu.dot_dimension_numbers<[1], [0], [0], [1], [0, 0, 1, 1], [], []>} : vector<256x8xf32>, vector<8x12xf32>, vector<256x12xf32> -> vector<256x12xf32>
    %78 = arith.addf %75, %77 : vector<256x12xf32>
    %79 = vector.extract_strided_slice %78 {offsets = [0, 0], sizes = [256, 4], strides = [1, 1]} : vector<256x12xf32> to vector<256x4xf32>
    %80 = vector.extract_strided_slice %79 {offsets = [255, 0], sizes = [1, 4], strides = [1, 1]} : vector<256x4xf32> to vector<1x4xf32>
    %81 = vector.extract_strided_slice %79 {offsets = [0, 0], sizes = [255, 4], strides = [1, 1]} : vector<256x4xf32> to vector<255x4xf32>
    %82 = tpu.concatenate %80, %81 in 0 : vector<1x4xf32>, vector<255x4xf32> -> vector<256x4xf32>
    %83 = vector.extract_strided_slice %78 {offsets = [0, 8], sizes = [256, 4], strides = [1, 1]} : vector<256x12xf32> to vector<256x4xf32>
    %84 = vector.extract_strided_slice %83 {offsets = [1, 0], sizes = [255, 4], strides = [1, 1]} : vector<256x4xf32> to vector<255x4xf32>
    %85 = vector.extract_strided_slice %83 {offsets = [0, 0], sizes = [1, 4], strides = [1, 1]} : vector<256x4xf32> to vector<1x4xf32>
    %86 = tpu.concatenate %84, %85 in 0 : vector<255x4xf32>, vector<1x4xf32> -> vector<256x4xf32>
    %87 = vector.extract_strided_slice %78 {offsets = [0, 4], sizes = [256, 4], strides = [1, 1]} : vector<256x12xf32> to vector<256x4xf32>
    %88 = vector.broadcast %38 : vector<256x1xf32> to vector<256x4xf32>
    %89 = arith.mulf %88, %82 : vector<256x4xf32>
    %90 = arith.addf %87, %89 : vector<256x4xf32>
    %91 = vector.broadcast %42 : vector<256x1xf32> to vector<256x4xf32>
    %92 = arith.mulf %91, %86 : vector<256x4xf32>
    %93 = arith.addf %90, %92 : vector<256x4xf32>
    %94 = vector.broadcast %11 : vector<1x4xf32> to vector<256x4xf32>
    %95 = arith.addf %93, %94 : vector<256x4xf32>
    %c0_52 = arith.constant 0 : index
    %c0_53 = arith.constant 0 : index
    %c0_54 = arith.constant 0 : index
    %96 = vector.load %arg12[%c0_52, %c0_53, %c0_54] : memref<1x256x4xf32, #tpu.memory_space<vmem>>, vector<1x256x4xf32>
    %97 = vector.shape_cast %96 : vector<1x256x4xf32> to vector<256x4xf32>
    %98 = vector.shape_cast %95 : vector<256x4xf32> to vector<1x256x4xf32>
    tpu.vector_store %arg12[%c0_52, %c0_53, %c0_54], %98 {strides = array<i32>} : memref<1x256x4xf32, #tpu.memory_space<vmem>>, vector<1x256x4xf32>,
    return
  }
  func.func @transform_0(%arg0: i32) -> (i32, i32, i32) {
    %c0_i32 = arith.constant 0 : i32
    %c0_i32_0 = arith.constant 0 : i32
    %c0_i32_1 = arith.constant 0 : i32
    return %arg0, %c0_i32, %c0_i32_0 : i32, i32, i32
  }
  func.func @transform_1(%arg0: i32) -> (i32, i32, i32) {
    %c0_i32 = arith.constant 0 : i32
    %c0_i32_0 = arith.constant 0 : i32
    %c0_i32_1 = arith.constant 0 : i32
    return %arg0, %c0_i32, %c0_i32_0 : i32, i32, i32
  }
  func.func @transform_2(%arg0: i32) -> (i32, i32) {
    %c0_i32 = arith.constant 0 : i32
    %c0_i32_0 = arith.constant 0 : i32
    %c0_i32_1 = arith.constant 0 : i32
    return %c0_i32, %c0_i32_0 : i32, i32
  }
  func.func @transform_3(%arg0: i32) -> (i32, i32) {
    %c0_i32 = arith.constant 0 : i32
    %c0_i32_0 = arith.constant 0 : i32
    %c0_i32_1 = arith.constant 0 : i32
    return %c0_i32, %c0_i32_0 : i32, i32
  }
  func.func @transform_4(%arg0: i32) -> (i32, i32) {
    %c0_i32 = arith.constant 0 : i32
    %c0_i32_0 = arith.constant 0 : i32
    %c0_i32_1 = arith.constant 0 : i32
    return %c0_i32, %c0_i32_0 : i32, i32
  }
  func.func @transform_5(%arg0: i32) -> (i32, i32) {
    %c0_i32 = arith.constant 0 : i32
    %c0_i32_0 = arith.constant 0 : i32
    %c0_i32_1 = arith.constant 0 : i32
    return %c0_i32, %c0_i32_0 : i32, i32
  }
  func.func @transform_6(%arg0: i32) -> (i32, i32) {
    %c0_i32 = arith.constant 0 : i32
    %c0_i32_0 = arith.constant 0 : i32
    %c0_i32_1 = arith.constant 0 : i32
    return %c0_i32, %c0_i32_0 : i32, i32
  }
  func.func @transform_7(%arg0: i32) -> (i32, i32) {
    %c0_i32 = arith.constant 0 : i32
    %c0_i32_0 = arith.constant 0 : i32
    %c0_i32_1 = arith.constant 0 : i32
    return %c0_i32, %c0_i32_0 : i32, i32
  }
  func.func @transform_8(%arg0: i32) -> (i32, i32) {
    %c0_i32 = arith.constant 0 : i32
    %c0_i32_0 = arith.constant 0 : i32
    %c0_i32_1 = arith.constant 0 : i32
    return %c0_i32, %c0_i32_0 : i32, i32
  }
  func.func @transform_9(%arg0: i32) -> (i32, i32, i32) {
    %c0_i32 = arith.constant 0 : i32
    %c0_i32_0 = arith.constant 0 : i32
    %c0_i32_1 = arith.constant 0 : i32
    %c0_i32_2 = arith.constant 0 : i32
    return %c0_i32, %c0_i32_0, %c0_i32_1 : i32, i32, i32
  }
  func.func @transform_10(%arg0: i32) -> (i32, i32) {
    %c0_i32 = arith.constant 0 : i32
    %c0_i32_0 = arith.constant 0 : i32
    %c0_i32_1 = arith.constant 0 : i32
    return %c0_i32, %c0_i32_0 : i32, i32
  }
  func.func @transform_11(%arg0: i32) -> (i32, i32, i32) {
    %c0_i32 = arith.constant 0 : i32
    %c0_i32_0 = arith.constant 0 : i32
    %c0_i32_1 = arith.constant 0 : i32
    return %arg0, %c0_i32, %c0_i32_0 : i32, i32, i32
  }
}

</mosaic_0001>

<bundles_post_ra>
// kernel: tpu_custom_call.1
= control target key start
LH: loop header
LB: loop body
LE: loop exit
PB: predicated region body
PF: predicated region fallthrough
CT: control target
= control target key end

     0   :  { %s4634_s17 = smov 0   ;;  %s6442_s0 = inlined_call_operand.vmem [shape: f32[2,256,2], index: 0, kind: input, shape index: {}]   ;;  %s6443_s1 = inlined_call_operand.vmem [shape: f32[2,256,2], index: 1, kind: input, shape index: {}]   ;;  %s6444_s2 = inlined_call_operand.vmem [shape: f32[1,2], index: 2, kind: input, shape index: {}]   ;;  %s6445_s3 = inlined_call_operand.vmem [shape: f32[1,2], index: 3, kind: input, shape index: {}]   ;;  %s6446_s4 = inlined_call_operand.vmem [shape: f32[1,2], index: 4, kind: input, shape index: {}]   ;;  %s6447_s5 = inlined_call_operand.vmem [shape: f32[1,2], index: 5, kind: input, shape index: {}]   ;;  %s6448_s6 = inlined_call_operand.vmem [shape: f32[2,8], index: 6, kind: input, shape index: {}]   ;;  %s6449_s7 = inlined_call_operand.vmem [shape: f32[2,8], index: 7, kind: input, shape index: {}]   ;;  %s6450_s8 = inlined_call_operand.vmem [shape: f32[1,8], index: 8, kind: input, shape index: {}]   ;;  %s6451_s9 = inlined_call_operand.vmem [shape: f32[3,8,12], index: 9, kind: input, shape index: {}]   ;;  %s6452_s10 = inlined_call_operand.vmem [shape: f32[1,4], index: 10, kind: input, shape index: {}]   ;;  %s6453_s11 = inlined_call_operand.vmem [shape: f32[2,256,4], index: 11, kind: output, shape index: {}]  }
   0x1 LB: > { %s3917_s18 = sadd.s32 4294967295, %s4569_s17   ;;  %p3921_p0 = scmp.ge.s32.totalorder %s4569_s17, 1  ;;  %s4569_s17 = sphi %s4634_s17, %s21_s17  }
   0x2   : > { %p347_p1 = scmp.lt.s32.totalorder %s4569_s17, 3 }
   0x4   : > { %p348_p2 = pnand %p3921_p0, %p347_p1 }
   0x6   : > { %351 = sbr.rel (%p348_p2) target bundleno = 898 (0x382), region = 64 }
   0xb   : > { %v417_v0 = vld [vmem:[%s6449_s7] sm:$0x3]  ;;  %vm1411_vm0 = vcmask 1041408   ;;  %p392_p3 = scmp.lt.s32.totalorder %s3917_s18, 1  ;;  %vm1314_vm1 = vcmask 15360   ;;  %vm407_vm2 = vcmask 64512  }
   0xc   : > { %4550 = vmatprep.subr.msk.mxu1 %vm1411_vm0, %v417_v0  ;;  %v416_v1 = vld [vmem:[%s6448_s6] sm:$0x3]  ;;  %4300 = vmatprep.subr.msk.mxu0 %vm1411_vm0, %v417_v0  ;;  %s4572_s12 = smov 4   ;;  %vm3071_vm11 = vcmask 1040384   ;;  %s4573_s13 = smov 124  }
   0xd   : > { %4551 = vmatpush3.msk.msra.mxu1 %vm1411_vm0, %v417_v0  ;;  %s6645_s18 = smov (!%p392_p3, %s3917_s18), 1  ;;  %4301 = vmatpush3.msk.msra.mxu0 %vm1411_vm0, %v417_v0  ;;  %v4658_v2 = vld [vmem:[%s6445_s3] ss:$0 sm:$0xff] }
   0xe   : > { %4350 = vmatprep.subr.msk.mxu1 %vm1411_vm0, %v416_v1  ;;  %s4653_s23 = sshll.u32 %s6645_s18, 8  ;;  %v4669_v3 = vld [vmem:[%s6447_s5] ss:$0 sm:$0xff] }
   0xf   : > { %s4664_s28 = scalar_lea.vmem %s6443_s1, %s4653_s23  ;;  %s4737_s14 = scalar_lea.vmem %s6442_s0, %s4653_s23 }
  0x10   : > { %v1190_v4 = vld [vmem:[%s4664_s28 + $0x80] sm:$0xff]  ;;  %v1191_v5 = vld [vmem:[%s4664_s28 + $0x88] sm:$0xff]  ;;  %v1192_v6 = vld [vmem:[%s4664_s28 + $0x90] sm:$0xff]  ;;  %s6368_s16 = scalar_lea.vmem %s6453_s11, %s4653_s23 }
  0x11   : > { %v1228_v7 = vmul.f32 %v4658_v2, %v1190_v4  ;;  %v1229_v8 = vmul.f32 %v4658_v2, %v1191_v5  ;;  %v1230_v9 = vmul.f32 %v4658_v2, %v1192_v6  ;;  %v1193_v10 = vld [vmem:[%s4664_s28 + $0x98] sm:$0xff]  ;;  %v1194_v11 = vld [vmem:[%s4664_s28 + $0xa0] sm:$0xff]  ;;  %v1195_v12 = vld [vmem:[%s4664_s28 + $0xa8] sm:$0xff] }
  0x12   : > { %v1231_v13 = vmul.f32 %v4658_v2, %v1193_v10  ;;  %v1232_v14 = vmul.f32 %v4658_v2, %v1194_v11  ;;  %v1196_v15 = vld [vmem:[%s4664_s28 + $0xb0] sm:$0xff]  ;;  %v1233_v20 = vmul.f32 %v4658_v2, %v1195_v12  ;;  %v1197_v26 = vld [vmem:[%s4664_s28 + $0xb8] sm:$0xff]  ;;  %v1198_v27 = vld [vmem:[%s4664_s28 + $0xc0] sm:$0xff] }
  0x13   : > { %v1266_v16 = vadd.f32 %v4669_v3, %v1228_v7  ;;  %v1267_v17 = vadd.f32 %v4669_v3, %v1229_v8  ;;  %v1268_v18 = vadd.f32 %v4669_v3, %v1230_v9  ;;  %v1234_v21 = vmul.f32 %v4658_v2, %v1196_v15  ;;  %v1199_v34 = vld [vmem:[%s4664_s28 + $0xc8] sm:$0xff]  ;;  %v1200_v35 = vld [vmem:[%s4664_s28 + $0xd0] sm:$0xff]  ;;  %v1174_v36 = vld [vmem:[%s4664_s28] sm:$0xff] }
  0x14   : > { %v1269_v19 = vadd.f32 %v4669_v3, %v1231_v13  ;;  %v1270_v25 = vadd.f32 %v4669_v3, %v1232_v14  ;;  %v1271_v29 = vadd.f32 %v4669_v3, %v1233_v20  ;;  %v1235_v31 = vmul.f32 %v4658_v2, %v1197_v26  ;;  %v1175_v37 = vld [vmem:[%s4664_s28 + $0x8] sm:$0xff]  ;;  %v1176_v38 = vld [vmem:[%s4664_s28 + $0x10] sm:$0xff]  ;;  %v1177_v39 = vld [vmem:[%s4664_s28 + $0x18] sm:$0xff] }
  0x15   : > { %v1298_v22 = vmax.f32 %v1266_v16, 0.0  ;;  %v1299_v23 = vmax.f32 %v1267_v17, 0.0  ;;  %v1300_v24 = vmax.f32 %v1268_v18, 0.0  ;;  %v1272_v30 = vadd.f32 %v4669_v3, %v1234_v21  ;;  %v1201_v44 = vld [vmem:[%s4664_s28 + $0xd8] sm:$0xff]  ;;  %v1202_v45 = vld [vmem:[%s4664_s28 + $0xe0] sm:$0xff]  ;;  %v1203_v54 = vld [vmem:[%s4664_s28 + $0xe8] sm:$0xff] }
  0x16   : > { %v1301_v28 = vmax.f32 %v1269_v19, 0.0  ;;  %v1302_v32 = vmax.f32 %v1270_v25, 0.0  ;;  %v1236_v33 = vmul.f32 %v4658_v2, %v1198_v27  ;;  %v1303_v40 = vmax.f32 %v1271_v29, 0.0  ;;  %v1178_v61 = vld [vmem:[%s4664_s28 + $0x20] sm:$0xff]  ;;  %v1179_v62 = vld [vmem:[%s4664_s28 + $0x28] sm:$0xff]  ;;  %v1180_v5 = vld [vmem:[%s4664_s28 + $0x30] sm:$0xff] }
  0x17   : > { %4326 = vmatprep.mubr.msk.f32.mxu1 %vm1314_vm1, %v1298_v22  ;;  %v1304_v41 = vmax.f32 %v1272_v30, 0.0  ;;  %v1273_v42 = vadd.f32 %v4669_v3, %v1235_v31  ;;  %v1237_v43 = vmul.f32 %v4658_v2, %v1199_v34  ;;  %v1238_v47 = vmul.f32 %v4658_v2, %v1200_v35  ;;  %v1181_v6 = vld [vmem:[%s4664_s28 + $0x38] sm:$0xff]  ;;  %v1204_v8 = vld [vmem:[%s4664_s28 + $0xf0] sm:$0xff]  ;;  %v4756_v21 = vld [vmem:[%s6444_s2] ss:$0 sm:$0xff] }
  0x18   : > { %4327 = vmatmul.mubr.msk.f32.vlgmr.msra.gmra.mxu1 %vm1314_vm1, %v1299_v23  ;;  %v1274_v46 = vadd.f32 %v4669_v3, %v1236_v33  ;;  %v1212_v48 = vmul.f32 %v4658_v2, %v1174_v36  ;;  %v1213_v49 = vmul.f32 %v4658_v2, %v1175_v37  ;;  %v1214_v50 = vmul.f32 %v4658_v2, %v1176_v38  ;;  %v1205_v12 = vld [vmem:[%s4664_s28 + $0xf8] sm:$0xff]  ;;  %v1034_v22 = vld [vmem:[%s4737_s14] sm:$0xff]  ;;  %v1035_v35 = vld [vmem:[%s4737_s14 + $0x8] sm:$0xff] }
  0x19   : > { %4351 = vmatpush3.msk.msra.mxu1 %vm1411_vm0, %v416_v1  ;;  %4329 = vmatprep.mubr.msk.f32.mxu1 %vm1314_vm1, %v1300_v24  ;;  %v1215_v51 = vmul.f32 %v4658_v2, %v1177_v39  ;;  %v1239_v52 = vmul.f32 %v4658_v2, %v1201_v44  ;;  %v1240_v53 = vmul.f32 %v4658_v2, %v1202_v45  ;;  %v1305_v57 = vmax.f32 %v1273_v42, 0.0  ;;  %v1182_v27 = vld [vmem:[%s4664_s28 + $0x40] sm:$0xff]  ;;  %v1036_v36 = vld [vmem:[%s4737_s14 + $0x10] sm:$0xff]  ;;  %v1185_v44 = vld [vmem:[%s4664_s28 + $0x58] sm:$0xff] }
  0x1a   : > { %v1250_v55 = vadd.f32 %v4669_v3, %v1212_v48  ;;  %v1251_v56 = vadd.f32 %v4669_v3, %v1213_v49  ;;  %v1275_v58 = vadd.f32 %v4669_v3, %v1237_v43  ;;  %v1252_v59 = vadd.f32 %v4669_v3, %v1214_v50 }
  0x1b   : > { %v1253_v60 = vadd.f32 %v4669_v3, %v1215_v51  ;;  %v1306_v63 = vmax.f32 %v1274_v46, 0.0  ;;  %v1276_v0 = vadd.f32 %v4669_v3, %v1238_v47  ;;  %v1241_v7 = vmul.f32 %v4658_v2, %v1203_v54 }
  0x1c   : > { %4330 = vmatmul.mubr.msk.f32.gmra.mxu1 %vm1314_vm1, %v1301_v28  ;;  %v1282_v1 = vmax.f32 %v1250_v55, 0.0  ;;  %v1283_v4 = vmax.f32 %v1251_v56, 0.0  ;;  %v1284_v9 = vmax.f32 %v1252_v59, 0.0  ;;  %v1277_v10 = vadd.f32 %v4669_v3, %v1239_v52  ;;  %v1183_v28 = vld [vmem:[%s4664_s28 + $0x48] sm:$0xff]  ;;  %v1037_v52 = vld [vmem:[%s4737_s14 + $0x18] sm:$0xff]  ;;  %v1186_v56 = vld [vmem:[%s4664_s28 + $0x60] sm:$0xff] }
  0x1d   : > { %4332 = vmatprep.mubr.msk.f32.mxu1 %vm1314_vm1, %v1302_v32  ;;  %v1278_v11 = vadd.f32 %v4669_v3, %v1240_v53  ;;  %v1216_v13 = vmul.f32 %v4658_v2, %v1178_v61  ;;  %v1217_v14 = vmul.f32 %v4658_v2, %v1179_v62  ;;  %v1307_v15 = vmax.f32 %v1275_v58, 0.0  ;;  %v1184_v32 = vld [vmem:[%s4664_s28 + $0x50] sm:$0xff]  ;;  %v1038_v62 = vld [vmem:[%s4737_s14 + $0x20] sm:$0xff] }
  0x1e   : > { %4302 = vmatprep.mubr.msk.f32.mxu0 %vm1314_vm1, %v1282_v1  ;;  %v1285_v16 = vmax.f32 %v1253_v60, 0.0  ;;  %v1218_v17 = vmul.f32 %v4658_v2, %v1180_v5  ;;  %v1219_v18 = vmul.f32 %v4658_v2, %v1181_v6  ;;  %v1308_v19 = vmax.f32 %v1276_v0, 0.0  ;;  %v1187_v60 = vld [vmem:[%s4664_s28 + $0x68] sm:$0xff] }
  0x1f   : > { %4303 = vmatmul.mubr.msk.f32.vlgmr.msra.gmra.mxu0 %vm1314_vm1, %v1283_v4  ;;  %v1242_v20 = vmul.f32 %v4658_v2, %v1204_v8  ;;  %v1254_v23 = vadd.f32 %v4669_v3, %v1216_v13  ;;  %v1255_v24 = vadd.f32 %v4669_v3, %v1217_v14  ;;  %v1243_v25 = vmul.f32 %v4658_v2, %v1205_v12 }
  0x20   : > { %4333 = vmatmul.mubr.msk.f32.gmra.mxu1 %vm1314_vm1, %v1303_v40  ;;  %4305 = vmatprep.mubr.msk.f32.mxu0 %vm1314_vm1, %v1284_v9  ;;  %v1256_v26 = vadd.f32 %v4669_v3, %v1218_v17  ;;  %v1309_v29 = vmax.f32 %v1277_v10, 0.0  ;;  %v1279_v30 = vadd.f32 %v4669_v3, %v1241_v7  ;;  %v1310_v33 = vmax.f32 %v1278_v11, 0.0  ;;  %v4779_v40 = vld [vmem:[%s6446_s4] ss:$0 sm:$0xff]  ;;  %v1039_v11 = vld [vmem:[%s4737_s14 + $0x28] sm:$0xff] }
  0x21   : > { %4335 = vmatprep.mubr.msk.f32.mxu1 %vm1314_vm1, %v1304_v41  ;;  %v1286_v31 = vmax.f32 %v1254_v23, 0.0  ;;  %v1072_v34 = vmul.f32 %v4756_v21, %v1034_v22  ;;  %v1287_v37 = vmax.f32 %v1255_v24, 0.0  ;;  %v1257_v38 = vadd.f32 %v4669_v3, %v1219_v18 }
  0x22   : > { %v1280_v39 = vadd.f32 %v4669_v3, %v1242_v20  ;;  %v1288_v41 = vmax.f32 %v1256_v26, 0.0  ;;  %v1220_v42 = vmul.f32 %v4658_v2, %v1182_v27  ;;  %v1221_v43 = vmul.f32 %v4658_v2, %v1183_v28  ;;  %v1041_v27 = vld [vmem:[%s4737_s14 + $0x38] sm:$0xff] }
  0x23   : > { %4306 = vmatmul.mubr.msk.f32.gmra.mxu0 %vm1314_vm1, %v1285_v16  ;;  %v1281_v45 = vadd.f32 %v4669_v3, %v1243_v25  ;;  %v1222_v46 = vmul.f32 %v4658_v2, %v1184_v32  ;;  %v1311_v47 = vmax.f32 %v1279_v30, 0.0  ;;  %v1073_v48 = vmul.f32 %v4756_v21, %v1035_v35  ;;  %v1040_v16 = vld [vmem:[%s4737_s14 + $0x30] sm:$0xff]  ;;  %v1042_v30 = vld [vmem:[%s4737_s14 + $0x40] sm:$0xff] }
  0x24   : > { %4336 = vmatmul.mubr.msk.f32.gmra.mxu1 %vm1314_vm1, %v1305_v57  ;;  %4308 = vmatprep.mubr.msk.f32.mxu0 %vm1314_vm1, %v1286_v31  ;;  %v1074_v49 = vmul.f32 %v4756_v21, %v1036_v36  ;;  %v1258_v50 = vadd.f32 %v4669_v3, %v1220_v42  ;;  %v1110_v51 = vadd.f32 %v4779_v40, %v1072_v34  ;;  %v1289_v53 = vmax.f32 %v1257_v38, 0.0  ;;  %v1043_v38 = vld [vmem:[%s4737_s14 + $0x48] sm:$0xff] }
  0x25   : > { %4338 = vmatprep.mubr.msk.f32.mxu1 %vm1314_vm1, %v1306_v63  ;;  %v1259_v54 = vadd.f32 %v4669_v3, %v1221_v43  ;;  %v1223_v55 = vmul.f32 %v4658_v2, %v1185_v44  ;;  %v1312_v57 = vmax.f32 %v1280_v39, 0.0  ;;  %v1260_v59 = vadd.f32 %v4669_v3, %v1222_v46  ;;  %v1188_v63 = vld [vmem:[%s4664_s28 + $0x70] sm:$0xff] }
  0x26   : > { %v1290_v58 = vmax.f32 %v1258_v50, 0.0  ;;  %v1313_v61 = vmax.f32 %v1281_v45, 0.0  ;;  %v1111_v0 = vadd.f32 %v4779_v40, %v1073_v48  ;;  %v1112_v1 = vadd.f32 %v4779_v40, %v1074_v49  ;;  %v1045_v48 = vld [vmem:[%s4737_s14 + $0x58] sm:$0xff]  ;;  %v1046_v49 = vld [vmem:[%s4737_s14 + $0x60] sm:$0xff] }
  0x27   : > { %4309 = vmatmul.mubr.msk.f32.gmra.mxu0 %vm1314_vm1, %v1287_v37  ;;  %v1075_v4 = vmul.f32 %v4756_v21, %v1037_v52  ;;  %v1224_v5 = vmul.f32 %v4658_v2, %v1186_v56  ;;  %v1142_v6 = vmax.f32 %v1110_v51, 0.0  ;;  %v1291_v7 = vmax.f32 %v1259_v54, 0.0  ;;  %v1047_v56 = vld [vmem:[%s4737_s14 + $0x68] sm:$0xff] }
  0x28   : > { %4339 = vmatmul.mubr.msk.f32.gmra.mxu1 %vm1314_vm1, %v1307_v15  ;;  %4311 = vmatprep.mubr.msk.f32.mxu0 %vm1314_vm1, %v1288_v41  ;;  %v1261_v8 = vadd.f32 %v4669_v3, %v1223_v55  ;;  %v1225_v9 = vmul.f32 %v4658_v2, %v1187_v60  ;;  %v1076_v10 = vmul.f32 %v4756_v21, %v1038_v62  ;;  %v1292_v12 = vmax.f32 %v1260_v59, 0.0  ;;  %v1189_v15 = vld [vmem:[%s4664_s28 + $0x78] sm:$0xff]  ;;  %v1044_v41 = vld [vmem:[%s4737_s14 + $0x50] sm:$0xff] }
  0x29   : > { %4341 = vmatprep.mubr.msk.f32.mxu1 %vm1314_vm1, %v1308_v19  ;;  %v1262_v13 = vadd.f32 %v4669_v3, %v1224_v5  ;;  %v1226_v14 = vmul.f32 %v4658_v2, %v1188_v63  ;;  %v1143_v17 = vmax.f32 %v1111_v0, 0.0  ;;  %v1144_v18 = vmax.f32 %v1112_v1, 0.0  ;;  %v1049_v0 = vld [vmem:[%s4737_s14 + $0x78] sm:$0xff]  ;;  %v1050_v1 = vld [vmem:[%s4737_s14 + $0x80] sm:$0xff] }
  0x2a   : > { %v1113_v19 = vadd.f32 %v4779_v40, %v1075_v4  ;;  %v1077_v20 = vmul.f32 %v4756_v21, %v1039_v11  ;;  %v1293_v22 = vmax.f32 %v1261_v8, 0.0  ;;  %v1263_v23 = vadd.f32 %v4669_v3, %v1225_v9  ;;  %v1052_v11 = vld [vmem:[%s4737_s14 + $0x90] sm:$0xff] }
  0x2b   : > { %4312 = vmatmul.mubr.msk.f32.gmra.mxu0 %vm1314_vm1, %v1289_v53  ;;  %v1227_v24 = vmul.f32 %v4658_v2, %v1189_v15  ;;  %v1114_v25 = vadd.f32 %v4779_v40, %v1076_v10  ;;  %v1078_v26 = vmul.f32 %v4756_v21, %v1040_v16  ;;  %v1294_v28 = vmax.f32 %v1262_v13, 0.0  ;;  %v1051_v10 = vld [vmem:[%s4737_s14 + $0x88] sm:$0xff] }
  0x2c   : > { %4342 = vmatmul.mubr.msk.f32.gmra.mxu1 %vm1314_vm1, %v1309_v29  ;;  %4314 = vmatprep.mubr.msk.f32.mxu0 %vm1314_vm1, %v1290_v58  ;;  %v1264_v29 = vadd.f32 %v4669_v3, %v1226_v14  ;;  %v1145_v31 = vmax.f32 %v1113_v19, 0.0  ;;  %v1115_v2 = vadd.f32 %v4779_v40, %v1077_v20  ;;  %v1079_v32 = vmul.f32 %v4756_v21, %v1041_v27  ;;  %v1054_v19 = vld [vmem:[%s4737_s14 + $0xa0] sm:$0xff]  ;;  %v1055_v27 = vld [vmem:[%s4737_s14 + $0xa8] sm:$0xff] }
  0x2d   : > { %4344 = vmatprep.mubr.msk.f32.mxu1 %vm1314_vm1, %v1310_v33  ;;  %v1295_v33 = vmax.f32 %v1263_v23, 0.0  ;;  %v1265_v34 = vadd.f32 %v4669_v3, %v1227_v24  ;;  %v1146_v35 = vmax.f32 %v1114_v25, 0.0  ;;  %v1116_v36 = vadd.f32 %v4779_v40, %v1078_v26 }
  0x2e   : > { %v1080_v37 = vmul.f32 %v4756_v21, %v1042_v30  ;;  %v1296_v39 = vmax.f32 %v1264_v29, 0.0  ;;  %v1147_v42 = vmax.f32 %v1115_v2, 0.0  ;;  %v1117_v43 = vadd.f32 %v4779_v40, %v1079_v32 }
  0x2f   : > { %4315 = vmatmul.mubr.msk.f32.gmra.mxu0 %vm1314_vm1, %v1291_v7  ;;  %v1081_v3 = vmul.f32 %v4756_v21, %v1043_v38  ;;  %v1297_v44 = vmax.f32 %v1265_v34, 0.0  ;;  %v1148_v45 = vmax.f32 %v1116_v36, 0.0  ;;  %v1083_v52 = vmul.f32 %v4756_v21, %v1045_v48  ;;  %v1057_v34 = vld [vmem:[%s4737_s14 + $0xb8] sm:$0xff] }
  0x30   : > { %4345 = vmatmul.mubr.msk.f32.gmra.mxu1 %vm1314_vm1, %v1311_v47  ;;  %4317 = vmatprep.mubr.msk.f32.mxu0 %vm1314_vm1, %v1292_v12  ;;  %v1118_v46 = vadd.f32 %v4779_v40, %v1080_v37  ;;  %v1082_v47 = vmul.f32 %v4756_v21, %v1044_v41  ;;  %v1149_v50 = vmax.f32 %v1117_v43, 0.0  ;;  %v1084_v55 = vmul.f32 %v4756_v21, %v1046_v49  ;;  %v1059_v43 = vld [vmem:[%s4737_s14 + $0xc8] sm:$0xff] }
  0x31   : > { %4347 = vmatprep.mubr.msk.f32.mxu1 %vm1314_vm1, %v1312_v57  ;;  %v1119_v51 = vadd.f32 %v4779_v40, %v1081_v3  ;;  %v1048_v57 = vld [vmem:[%s4737_s14 + $0x70] sm:$0xff]  ;;  %v1121_v59 = vadd.f32 %v4779_v40, %v1083_v52  ;;  %v1085_v60 = vmul.f32 %v4756_v21, %v1047_v56  ;;  %v1088_v9 = vmul.f32 %v4756_v21, %v1050_v1 }
  0x32   : > { %v1150_v53 = vmax.f32 %v1118_v46, 0.0  ;;  %v1120_v54 = vadd.f32 %v4779_v40, %v1082_v47  ;;  %v1122_v62 = vadd.f32 %v4779_v40, %v1084_v55  ;;  %v1086_v63 = vmul.f32 %v4756_v21, %v1048_v57  ;;  %v1060_v3 = vld [vmem:[%s4737_s14 + $0xd0] sm:$0xff] }
  0x33   : > { %4318 = vmatmul.mubr.msk.f32.gmra.mxu0 %vm1314_vm1, %v1293_v22  ;;  %v1151_v58 = vmax.f32 %v1119_v51, 0.0  ;;  %v1153_v4 = vmax.f32 %v1121_v59, 0.0  ;;  %v1123_v5 = vadd.f32 %v4779_v40, %v1085_v60  ;;  %v1089_v14 = vmul.f32 %v4756_v21, %v1051_v10  ;;  %v1062_v51 = vld [vmem:[%s4737_s14 + $0xe0] sm:$0xff]  ;;  %v1064_v59 = vld [vmem:[%s4737_s14 + $0xf0] sm:$0xff] }
  0x34   : > { %4348 = vmatmul.mubr.msk.f32.gmra.mxu1 %vm1314_vm1, %v1313_v61  ;;  %4320 = vmatprep.mubr.msk.f32.mxu0 %vm1314_vm1, %v1294_v28  ;;  %v1152_v61 = vmax.f32 %v1120_v54, 0.0  ;;  %v1154_v7 = vmax.f32 %v1122_v62, 0.0  ;;  %v1124_v8 = vadd.f32 %v4779_v40, %v1086_v63  ;;  %v1126_v16 = vadd.f32 %v4779_v40, %v1088_v9  ;;  %v1056_v28 = vld [vmem:[%s4737_s14 + $0xb0] sm:$0xff] }
  0x35   : > { %4352 = vmatprep.mubr.msk.f32.mxu1 %vm1314_vm1, %v1142_v6  ;;  %v1087_v6 = vmul.f32 %v4756_v21, %v1049_v0  ;;  %v1155_v12 = vmax.f32 %v1123_v5, 0.0  ;;  %v1127_v22 = vadd.f32 %v4779_v40, %v1089_v14  ;;  %v1092_v26 = vmul.f32 %v4756_v21, %v1054_v19 }
  0x36   : > { %v1156_v15 = vmax.f32 %v1124_v8, 0.0  ;;  %v1158_v24 = vmax.f32 %v1126_v16, 0.0  ;;  %v1095_v38 = vmul.f32 %v4756_v21, %v1057_v34  ;;  %v1097_v46 = vmul.f32 %v4756_v21, %v1059_v43  ;;  %v3928_v8 = vld [vmem:[%s6451_s9 + $0x8] sm:$0xff]  ;;  %v5001_v43 = vld [vmem:[%s6450_s8] ss:$0 sm:$0xff] }
  0x37   : > { %4321 = vmatmul.mubr.msk.f32.gmra.mxu0 %vm1314_vm1, %v1295_v33  ;;  %v1125_v13 = vadd.f32 %v4779_v40, %v1087_v6  ;;  %v1159_v29 = vmax.f32 %v1127_v22, 0.0  ;;  %v1130_v32 = vadd.f32 %v4779_v40, %v1092_v26  ;;  %v1094_v33 = vmul.f32 %v4756_v21, %v1056_v28  ;;  %4400 = vmatprep.subr.mxu0 %v3928_v8 }
  0x38   : > { %4353 = vmatmul.mubr.msk.f32.vlgmr.msra.gmra.mxu1 %vm1314_vm1, %v1143_v17  ;;  %4323 = vmatprep.mubr.msk.f32.mxu0 %vm1314_vm1, %v1296_v39  ;;  %v1090_v17 = vmul.f32 %v4756_v21, %v1052_v11  ;;  %v1098_v49 = vmul.f32 %v4756_v21, %v1060_v3  ;;  %v1100_v57 = vmul.f32 %v4756_v21, %v1062_v51  ;;  %v6454_v14 = vmov 0.0  }
  0x39   : > { %4355 = vmatprep.mubr.msk.f32.mxu1 %vm1314_vm1, %v1144_v18  ;;  %v1053_v18 = vld [vmem:[%s4737_s14 + $0x98] sm:$0xff]  ;;  %v1157_v20 = vmax.f32 %v1125_v13, 0.0  ;;  %v1162_v39 = vmax.f32 %v1130_v32, 0.0  ;;  %v1132_v41 = vadd.f32 %v4779_v40, %v1094_v33  ;;  %v1102_v1 = vmul.f32 %v4756_v21, %v1064_v59  ;;  %4401 = vmatpush3.msra.mxu0 %v3928_v8  ;;  %408 = vst.msk [vmem:[#allocation2] sm:$0xff] %vm407_vm2, %v6454_v14 }
  0x3a   : > { %v1091_v23 = vmul.f32 %v4756_v21, %v1053_v18  ;;  %v1128_v25 = vadd.f32 %v4779_v40, %v1090_v17  ;;  %v1136_v56 = vadd.f32 %v4779_v40, %v1098_v49  ;;  %v1138_v0 = vadd.f32 %v4779_v40, %v1100_v57  ;;  %409 = vst.msk [vmem:[#allocation2 + $0x8] sm:$0xff] %vm407_vm2, %v6454_v14  ;;  %v4963_v17 = vld [vmem:[%s6451_s9 + $0x10] sm:$0xff] }
  0x3b   : > { %4324 = vmatmul.mubr.msk.f32.gmra.mxu0 %vm1314_vm1, %v1297_v44  ;;  %v1164_v47 = vmax.f32 %v1132_v41, 0.0  ;;  %v1140_v10 = vadd.f32 %v4779_v40, %v1102_v1  ;;  %410 = vst.msk [vmem:[#allocation2 + $0x110] sm:$0xff] %vm407_vm2, %v6454_v14  ;;  %411 = vst.msk [vmem:[#allocation2 + $0x118] sm:$0xff] %vm407_vm2, %v6454_v14  ;;  %4500 = vmatprep.subr.mxu0 %v4963_v17  ;;  %vm3167_vm0 = vcmask 1046528  }
  0x3c   : > { %4356 = vmatmul.mubr.msk.f32.gmra.mxu1 %vm1314_vm1, %v1145_v31  ;;  %v1129_v30 = vadd.f32 %v4779_v40, %v1091_v23  ;;  %v1093_v31 = vmul.f32 %v4756_v21, %v1055_v27  ;;  %v1160_v2 = vmax.f32 %v1128_v25, 0.0  ;;  %v1168_v63 = vmax.f32 %v1136_v56, 0.0 }
  0x3d   : > { %4358 = vmatprep.mubr.msk.f32.mxu1 %vm1314_vm1, %v1146_v35  ;;  %v1058_v35 = vld [vmem:[%s4737_s14 + $0xc0] sm:$0xff]  ;;  %v1170_v9 = vmax.f32 %v1138_v0, 0.0  ;;  %v1172_v13 = vmax.f32 %v1140_v10, 0.0 }
  0x3e   : > { %v1161_v36 = vmax.f32 %v1129_v30, 0.0  ;;  %v1131_v37 = vadd.f32 %v4779_v40, %v1093_v31 }
  0x40   : > { %4359 = vmatmul.mubr.msk.f32.gmra.mxu1 %vm1314_vm1, %v1147_v42  ;;  %v1096_v42 = vmul.f32 %v4756_v21, %v1058_v35  ;;  %v1163_v44 = vmax.f32 %v1131_v37, 0.0 }
  0x41   : > { %4361 = vmatprep.mubr.msk.f32.mxu1 %vm1314_vm1, %v1148_v45  ;;  %v1133_v45 = vadd.f32 %v4779_v40, %v1095_v38  ;;  %v2067_v16 = vld [vmem:[#allocation2 + $0x8] sm:$0xff] }
  0x42   : > { %v1134_v48 = vadd.f32 %v4779_v40, %v1096_v42 }
  0x43   : > { %v1165_v52 = vmax.f32 %v1133_v45, 0.0 }
  0x44   : > { %4362 = vmatmul.mubr.msk.f32.gmra.mxu1 %vm1314_vm1, %v1149_v50  ;;  %v1061_v50 = vld [vmem:[%s4737_s14 + $0xd8] sm:$0xff]  ;;  %v1166_v55 = vmax.f32 %v1134_v48, 0.0 }
  0x45   : > { %4364 = vmatprep.mubr.msk.f32.mxu1 %vm1314_vm1, %v1150_v53  ;;  %v1135_v53 = vadd.f32 %v4779_v40, %v1097_v46  ;;  %v1099_v54 = vmul.f32 %v4756_v21, %v1061_v50 }
  0x47   : > { %v1167_v60 = vmax.f32 %v1135_v53, 0.0 }
  0x48   : > { %4365 = vmatmul.mubr.msk.f32.gmra.mxu1 %vm1314_vm1, %v1151_v58  ;;  %v1063_v58 = vld [vmem:[%s4737_s14 + $0xe8] sm:$0xff] }
  0x49   : > { %4367 = vmatprep.mubr.msk.f32.mxu1 %vm1314_vm1, %v1152_v61  ;;  %v1137_v61 = vadd.f32 %v4779_v40, %v1099_v54  ;;  %v1101_v62 = vmul.f32 %v4756_v21, %v1063_v58 }
  0x4b   : > { %v1169_v5 = vmax.f32 %v1137_v61, 0.0  ;;  %v1139_v6 = vadd.f32 %v4779_v40, %v1101_v62 }
  0x4c   : > { %4368 = vmatmul.mubr.msk.f32.gmra.mxu1 %vm1314_vm1, %v1153_v4  ;;  %v1065_v4 = vld [vmem:[%s4737_s14 + $0xf8] sm:$0xff] }
  0x4d   : > { %4370 = vmatprep.mubr.msk.f32.mxu1 %vm1314_vm1, %v1154_v7  ;;  %v1103_v7 = vmul.f32 %v4756_v21, %v1065_v4  ;;  %v1171_v11 = vmax.f32 %v1139_v6, 0.0 }
  0x50   : > { %4371 = vmatmul.mubr.msk.f32.gmra.mxu1 %vm1314_vm1, %v1155_v12  ;;  %v1141_v12 = vadd.f32 %v4779_v40, %v1103_v7  ;;  %v420_v40 = vld [vmem:[%s6451_s9] sm:$0xff] }
  0x51   : > { %4373 = vmatprep.mubr.msk.f32.mxu1 %vm1314_vm1, %v1156_v15  ;;  %4450 = vmatprep.subr.mxu1 %v420_v40  ;;  %v2066_v15 = vld [vmem:[#allocation2] sm:$0xff] }
  0x52   : > { %v1173_v21 = vmax.f32 %v1141_v12, 0.0  ;;  %4451 = vmatpush3.msra.mxu1 %v420_v40 }
  0x54   : > { %4374 = vmatmul.mubr.msk.f32.gmra.mxu1 %vm1314_vm1, %v1157_v20 }
  0x55   : > { %4376 = vmatprep.mubr.msk.f32.mxu1 %vm1314_vm1, %v1158_v24 }
  0x58   : > { %4377 = vmatmul.mubr.msk.f32.gmra.mxu1 %vm1314_vm1, %v1159_v29 }
  0x59   : > { %4379 = vmatprep.mubr.msk.f32.mxu1 %vm1314_vm1, %v1160_v2 }
  0x5c   : > { %4380 = vmatmul.mubr.msk.f32.gmra.mxu1 %vm1314_vm1, %v1161_v36 }
  0x5d   : > { %4382 = vmatprep.mubr.msk.f32.mxu1 %vm1314_vm1, %v1162_v39 }
  0x60   : > { %4383 = vmatmul.mubr.msk.f32.gmra.mxu1 %vm1314_vm1, %v1163_v44 }
  0x61   : > { %4385 = vmatprep.mubr.msk.f32.mxu1 %vm1314_vm1, %v1164_v47 }
  0x64   : > { %4386 = vmatmul.mubr.msk.f32.gmra.mxu1 %vm1314_vm1, %v1165_v52 }
  0x65   : > { %4388 = vmatprep.mubr.msk.f32.mxu1 %vm1314_vm1, %v1166_v55 }
  0x68   : > { %4389 = vmatmul.mubr.msk.f32.gmra.mxu1 %vm1314_vm1, %v1167_v60 }
  0x69   : > { %4391 = vmatprep.mubr.msk.f32.mxu1 %vm1314_vm1, %v1168_v63 }
  0x6c   : > { %4392 = vmatmul.mubr.msk.f32.gmra.mxu1 %vm1314_vm1, %v1169_v5 }
  0x6d   : > { %4394 = vmatprep.mubr.msk.f32.mxu1 %vm1314_vm1, %v1170_v9 }
  0x70   : > { %4395 = vmatmul.mubr.msk.f32.gmra.mxu1 %vm1314_vm1, %v1171_v11 }
  0x71   : > { %4397 = vmatprep.mubr.msk.f32.mxu1 %vm1314_vm1, %v1172_v13 }
  0x74   : > { %4398 = vmatmul.mubr.msk.f32.gmra.mxu1 %vm1314_vm1, %v1173_v21 }
  0x75   : > { %4452 = vmatprep.mubr.msk.f32.mxu1 %vm407_vm2, %v2066_v15 }
  0x78   : > { %4453 = vmatmul.mubr.msk.f32.vlgmr.msra.gmra.mxu1 %vm407_vm2, %v2067_v16 }
  0xd8   : > { %v4966_v18 = vpop.f32.mrf.mxu1 }
  0xda   : > { %v4968_v19 = vpop.f32.mrf.mxu1 }
  0xdc   : > { %v4970_v20 = vpop.f32.mrf.mxu1 }
  0xde   : > { %v4972_v22 = vpop.f32.mrf.mxu1 }
  0xdf   : > { %v4304_v26 = vpop.f32.mrf.mxu0 }
  0xe0   : > { %v4974_v23 = vpop.f32.mrf.mxu1 }
  0xe1   : > { %v1481_v28 = vpop.f32.mrf.mxu0 }
  0xe2   : > { %v4976_v24 = vpop.f32.mrf.mxu1 }
  0xe3   : > { %v4307_v30 = vpop.f32.mrf.mxu0 }
  0xe4   : > { %v4978_v25 = vpop.f32.mrf.mxu1 }
  0xe5   : > { %v1491_v2 = vpop.f32.mrf.mxu0 }
  0xe6   : > { %v4980_v27 = vpop.f32.mrf.mxu1 }
  0xe7   : > { %v4310_v33 = vpop.f32.mrf.mxu0 }
  0xe8   : > { %v4982_v29 = vpop.f32.mrf.mxu1 }
  0xe9   : > { %v1501_v35 = vpop.f32.mrf.mxu0 }
  0xea   : > { %v4984_v31 = vpop.f32.mrf.mxu1 }
  0xeb   : > { %v4313_v38 = vpop.f32.mrf.mxu0 }
  0xec   : > { %v4986_v32 = vpop.f32.mrf.mxu1 }
  0xed   : > { %v1511_v42 = vpop.f32.mrf.mxu0 }
  0xee   : > { %v4988_v34 = vpop.f32.mrf.mxu1 }
  0xef   : > { %v4316_v46 = vpop.f32.mrf.mxu0 }
  0xf0   : > { %v4990_v36 = vpop.f32.mrf.mxu1 }
  0xf1   : > { %v1521_v54 = vpop.f32.mrf.mxu0 }
  0xf2   : > { %v4992_v37 = vpop.f32.mrf.mxu1 }
  0xf3   : > { %v4319_v63 = vpop.f32.mrf.mxu0 }
  0xf4   : > { %v4994_v39 = vpop.f32.mrf.mxu1 }
  0xf5   : > { %v1531_v10 = vpop.f32.mrf.mxu0 }
  0xf6   : > { %v4996_v41 = vpop.f32.mrf.mxu1 }
  0xf8   : > { %v4354_v3 = vpop.f32.mrf.mxu1 }
  0xf9   : > { %v1811_v44 = vadd.f32 %v4354_v3, %v4304_v26 }
  0xfa   : > { %v1805_v45 = vpop.f32.mrf.mxu1 }
  0xfb   : > { %v1971_v47 = vadd.f32 %v5001_v43, %v1811_v44  ;;  %v1806_v48 = vadd.f32 %v1805_v45, %v1481_v28 }
  0xfc   : > { %v4357_v49 = vpop.f32.mrf.mxu1 }
  0xfd   : > { %v2003_v50 = vmax.f32 %v1971_v47, 0.0  ;;  %v1970_v51 = vadd.f32 %v5001_v43, %v1806_v48  ;;  %v1821_v52 = vadd.f32 %v4357_v49, %v4307_v30 }
  0xfe   : > { %v1815_v53 = vpop.f32.mrf.mxu1 }
  0xff   : > { %2035 = vst.msk [vmem:[#allocation2 + $0x18] sm:$0xff] %vm407_vm2, %v2003_v50  ;;  %v2002_v55 = vmax.f32 %v1970_v51, 0.0  ;;  %v1973_v56 = vadd.f32 %v5001_v43, %v1821_v52  ;;  %v1816_v57 = vadd.f32 %v1815_v53, %v1491_v2  ;;  %v4322_v2 = vpop.f32.mrf.mxu0 }
 0x100   : > { %v4360_v58 = vpop.f32.mrf.mxu1 }
 0x101   : > { %2034 = vst.msk [vmem:[#allocation2 + $0x10] sm:$0xff] %vm407_vm2, %v2002_v55  ;;  %v2005_v59 = vmax.f32 %v1973_v56, 0.0  ;;  %v1972_v60 = vadd.f32 %v5001_v43, %v1816_v57  ;;  %v1831_v61 = vadd.f32 %v4360_v58, %v4310_v33 }
 0x102   : > { %v1825_v62 = vpop.f32.mrf.mxu1 }
 0x103   : > { %2037 = vst.msk [vmem:[#allocation2 + $0x28] sm:$0xff] %vm407_vm2, %v2005_v59  ;;  %v2004_v0 = vmax.f32 %v1972_v60, 0.0  ;;  %v1975_v1 = vadd.f32 %v5001_v43, %v1831_v61  ;;  %v1826_v4 = vadd.f32 %v1825_v62, %v1501_v35 }
 0x104   : > { %v4363_v5 = vpop.f32.mrf.mxu1 }
 0x105   : > { %2036 = vst.msk [vmem:[#allocation2 + $0x20] sm:$0xff] %vm407_vm2, %v2004_v0  ;;  %v2007_v6 = vmax.f32 %v1975_v1, 0.0  ;;  %v1974_v7 = vadd.f32 %v5001_v43, %v1826_v4  ;;  %v1841_v8 = vadd.f32 %v4363_v5, %v4313_v38 }
 0x106   : > { %v1835_v9 = vpop.f32.mrf.mxu1  ;;  %v2069_v28 = vld [vmem:[#allocation2 + $0x18] sm:$0xff] }
 0x107   : > { %2039 = vst.msk [vmem:[#allocation2 + $0x38] sm:$0xff] %vm407_vm2, %v2007_v6  ;;  %v2006_v11 = vmax.f32 %v1974_v7, 0.0  ;;  %v1977_v12 = vadd.f32 %v5001_v43, %v1841_v8  ;;  %v1836_v13 = vadd.f32 %v1835_v9, %v1511_v42 }
 0x108   : > { %v4366_v21 = vpop.f32.mrf.mxu1  ;;  %v2068_v40 = vld [vmem:[#allocation2 + $0x10] sm:$0xff] }
 0x109   : > { %2038 = vst.msk [vmem:[#allocation2 + $0x30] sm:$0xff] %vm407_vm2, %v2006_v11  ;;  %v2009_v15 = vmax.f32 %v1977_v12, 0.0  ;;  %v1976_v16 = vadd.f32 %v5001_v43, %v1836_v13  ;;  %v1851_v26 = vadd.f32 %v4366_v21, %v4316_v46  ;;  %4402 = vmatprep.mubr.msk.f32.mxu0 %vm407_vm2, %v2068_v40  ;;  %4455 = vmatprep.mubr.msk.f32.mxu1 %vm407_vm2, %v2068_v40 }
 0x10a   : > { %v1845_v30 = vpop.f32.mrf.mxu1  ;;  %4403 = vmatmul.mubr.msk.f32.vlgmr.msra.gmra.mxu0 %vm407_vm2, %v2069_v28  ;;  %4456 = vmatmul.mubr.msk.f32.gmra.mxu1 %vm407_vm2, %v2069_v28  ;;  %v5032_v47 = vld [vmem:[#allocation2 + $0x28] sm:$0xff] }
 0x10b   : > { %2041 = vst.msk [vmem:[#allocation2 + $0x48] sm:$0xff] %vm407_vm2, %v2009_v15  ;;  %v2008_v33 = vmax.f32 %v1976_v16, 0.0  ;;  %v1979_v35 = vadd.f32 %v5001_v43, %v1851_v26  ;;  %v1846_v38 = vadd.f32 %v1845_v30, %v1521_v54  ;;  %4501 = vmatpush3.msra.mxu0 %v4963_v17  ;;  %v1541_v17 = vpop.f32.mrf.mxu0 }
 0x10c   : > { %v4369_v42 = vpop.f32.mrf.mxu1  ;;  %v5024_v3 = vld [vmem:[#allocation2 + $0x20] sm:$0xff] }
 0x10d   : > { %2040 = vst.msk [vmem:[#allocation2 + $0x40] sm:$0xff] %vm407_vm2, %v2008_v33  ;;  %v2011_v44 = vmax.f32 %v1979_v35, 0.0  ;;  %v1978_v45 = vadd.f32 %v5001_v43, %v1846_v38  ;;  %v1861_v46 = vadd.f32 %v4369_v42, %v4319_v63  ;;  %4405 = vmatprep.mubr.msk.f32.mxu0 %vm407_vm2, %v5024_v3  ;;  %4458 = vmatprep.mubr.msk.f32.mxu1 %vm407_vm2, %v5024_v3  ;;  %v4325_v58 = vpop.f32.mrf.mxu0 }
 0x10e   : > { %v1855_v48 = vpop.f32.mrf.mxu1  ;;  %4406 = vmatmul.mubr.msk.f32.gmra.mxu0 %vm407_vm2, %v5032_v47  ;;  %4459 = vmatmul.mubr.msk.f32.gmra.mxu1 %vm407_vm2, %v5032_v47  ;;  %v5048_v57 = vld [vmem:[#allocation2 + $0x38] sm:$0xff] }
 0x10f   : > { %2043 = vst.msk [vmem:[#allocation2 + $0x58] sm:$0xff] %vm407_vm2, %v2011_v44  ;;  %v2010_v49 = vmax.f32 %v1978_v45, 0.0  ;;  %v1981_v50 = vadd.f32 %v5001_v43, %v1861_v46  ;;  %v1856_v51 = vadd.f32 %v1855_v48, %v1531_v10  ;;  %v1551_v7 = vpop.f32.mrf.mxu0 }
 0x110   : > { %v4372_v52 = vpop.f32.mrf.mxu1  ;;  %v5040_v53 = vld [vmem:[#allocation2 + $0x30] sm:$0xff] }
 0x111   : > { %2042 = vst.msk [vmem:[#allocation2 + $0x50] sm:$0xff] %vm407_vm2, %v2010_v49  ;;  %v2013_v54 = vmax.f32 %v1981_v50, 0.0  ;;  %v1980_v55 = vadd.f32 %v5001_v43, %v1856_v51  ;;  %v1871_v56 = vadd.f32 %v4372_v52, %v4322_v2  ;;  %4408 = vmatprep.mubr.msk.f32.mxu0 %vm407_vm2, %v5040_v53  ;;  %4461 = vmatprep.mubr.msk.f32.mxu1 %vm407_vm2, %v5040_v53 }
 0x112   : > { %v1865_v59 = vpop.f32.mrf.mxu1  ;;  %4409 = vmatmul.mubr.msk.f32.gmra.mxu0 %vm407_vm2, %v5048_v57  ;;  %4462 = vmatmul.mubr.msk.f32.gmra.mxu1 %vm407_vm2, %v5048_v57  ;;  %v5064_v6 = vld [vmem:[#allocation2 + $0x48] sm:$0xff] }
 0x113   : > { %2045 = vst.msk [vmem:[#allocation2 + $0x68] sm:$0xff] %vm407_vm2, %v2013_v54  ;;  %v2012_v60 = vmax.f32 %v1980_v55, 0.0  ;;  %v1983_v61 = vadd.f32 %v5001_v43, %v1871_v56  ;;  %v1866_v62 = vadd.f32 %v1865_v59, %v1541_v17 }
 0x114   : > { %v4375_v63 = vpop.f32.mrf.mxu1  ;;  %v5056_v0 = vld [vmem:[#allocation2 + $0x40] sm:$0xff] }
 0x115   : > { %2044 = vst.msk [vmem:[#allocation2 + $0x60] sm:$0xff] %vm407_vm2, %v2012_v60  ;;  %v2015_v1 = vmax.f32 %v1983_v61, 0.0  ;;  %v1982_v4 = vadd.f32 %v5001_v43, %v1866_v62  ;;  %v1881_v5 = vadd.f32 %v4375_v63, %v4325_v58  ;;  %4411 = vmatprep.mubr.msk.f32.mxu0 %vm407_vm2, %v5056_v0  ;;  %4464 = vmatprep.mubr.msk.f32.mxu1 %vm407_vm2, %v5056_v0 }
 0x116   : > { %v1875_v8 = vpop.f32.mrf.mxu1  ;;  %4412 = vmatmul.mubr.msk.f32.gmra.mxu0 %vm407_vm2, %v5064_v6  ;;  %4465 = vmatmul.mubr.msk.f32.gmra.mxu1 %vm407_vm2, %v5064_v6  ;;  %v5081_v16 = vld [vmem:[#allocation2 + $0x58] sm:$0xff] }
 0x117   : > { %2047 = vst.msk [vmem:[#allocation2 + $0x78] sm:$0xff] %vm407_vm2, %v2015_v1  ;;  %v2014_v9 = vmax.f32 %v1982_v4, 0.0  ;;  %v1985_v10 = vadd.f32 %v5001_v43, %v1881_v5  ;;  %v1876_v11 = vadd.f32 %v1875_v8, %v1551_v7 }
 0x118   : > { %v4378_v12 = vpop.f32.mrf.mxu1  ;;  %v5072_v13 = vld [vmem:[#allocation2 + $0x50] sm:$0xff] }
 0x119   : > { %2046 = vst.msk [vmem:[#allocation2 + $0x70] sm:$0xff] %vm407_vm2, %v2014_v9  ;;  %v2017_v21 = vmax.f32 %v1985_v10, 0.0  ;;  %v1984_v40 = vadd.f32 %v5001_v43, %v1876_v11  ;;  %v1891_v15 = vadd.f32 %v4378_v12, %v4966_v18  ;;  %4414 = vmatprep.mubr.msk.f32.mxu0 %vm407_vm2, %v5072_v13  ;;  %4467 = vmatprep.mubr.msk.f32.mxu1 %vm407_vm2, %v5072_v13 }
 0x11a   : > { %v1885_v26 = vpop.f32.mrf.mxu1  ;;  %4415 = vmatmul.mubr.msk.f32.gmra.mxu0 %vm407_vm2, %v5081_v16  ;;  %4468 = vmatmul.mubr.msk.f32.gmra.mxu1 %vm407_vm2, %v5081_v16  ;;  %v5099_v44 = vld [vmem:[#allocation2 + $0x68] sm:$0xff] }
 0x11b   : > { %2049 = vst.msk [vmem:[#allocation2 + $0x88] sm:$0xff] %vm407_vm2, %v2017_v21  ;;  %v2016_v28 = vmax.f32 %v1984_v40, 0.0  ;;  %v1987_v18 = vadd.f32 %v5001_v43, %v1891_v15  ;;  %v1886_v30 = vadd.f32 %v1885_v26, %v4968_v19 }
 0x11c   : > { %v4381_v2 = vpop.f32.mrf.mxu1  ;;  %v5090_v33 = vld [vmem:[#allocation2 + $0x60] sm:$0xff] }
 0x11d   : > { %2048 = vst.msk [vmem:[#allocation2 + $0x80] sm:$0xff] %vm407_vm2, %v2016_v28  ;;  %v2019_v35 = vmax.f32 %v1987_v18, 0.0  ;;  %v1986_v38 = vadd.f32 %v5001_v43, %v1886_v30  ;;  %v1901_v42 = vadd.f32 %v4381_v2, %v4970_v20  ;;  %4417 = vmatprep.mubr.msk.f32.mxu0 %vm407_vm2, %v5090_v33  ;;  %4470 = vmatprep.mubr.msk.f32.mxu1 %vm407_vm2, %v5090_v33 }
 0x11e   : > { %v1895_v45 = vpop.f32.mrf.mxu1  ;;  %4418 = vmatmul.mubr.msk.f32.gmra.mxu0 %vm407_vm2, %v5099_v44  ;;  %4471 = vmatmul.mubr.msk.f32.gmra.mxu1 %vm407_vm2, %v5099_v44  ;;  %v5117_v52 = vld [vmem:[#allocation2 + $0x78] sm:$0xff] }
 0x11f   : > { %2051 = vst.msk [vmem:[#allocation2 + $0x98] sm:$0xff] %vm407_vm2, %v2019_v35  ;;  %v2018_v19 = vmax.f32 %v1986_v38, 0.0  ;;  %v1989_v20 = vadd.f32 %v5001_v43, %v1901_v42  ;;  %v1896_v46 = vadd.f32 %v1895_v45, %v4972_v22 }
 0x120   : > { %v4384_v48 = vpop.f32.mrf.mxu1  ;;  %v5108_v17 = vld [vmem:[#allocation2 + $0x70] sm:$0xff] }
 0x121   : > { %2050 = vst.msk [vmem:[#allocation2 + $0x90] sm:$0xff] %vm407_vm2, %v2018_v19  ;;  %v2021_v49 = vmax.f32 %v1989_v20, 0.0  ;;  %v1988_v50 = vadd.f32 %v5001_v43, %v1896_v46  ;;  %v1911_v51 = vadd.f32 %v4384_v48, %v4974_v23  ;;  %4420 = vmatprep.mubr.msk.f32.mxu0 %vm407_vm2, %v5108_v17  ;;  %4473 = vmatprep.mubr.msk.f32.mxu1 %vm407_vm2, %v5108_v17 }
 0x122   : > { %v1905_v54 = vpop.f32.mrf.mxu1  ;;  %4421 = vmatmul.mubr.msk.f32.gmra.mxu0 %vm407_vm2, %v5117_v52  ;;  %4474 = vmatmul.mubr.msk.f32.gmra.mxu1 %vm407_vm2, %v5117_v52  ;;  %v5135_v62 = vld [vmem:[#allocation2 + $0x88] sm:$0xff] }
 0x123   : > { %2053 = vst.msk [vmem:[#allocation2 + $0xa8] sm:$0xff] %vm407_vm2, %v2021_v49  ;;  %v2020_v22 = vmax.f32 %v1988_v50, 0.0  ;;  %v1991_v23 = vadd.f32 %v5001_v43, %v1911_v51  ;;  %v1906_v55 = vadd.f32 %v1905_v54, %v4976_v24 }
 0x124   : > { %v4387_v56 = vpop.f32.mrf.mxu1  ;;  %v5126_v58 = vld [vmem:[#allocation2 + $0x80] sm:$0xff] }
 0x125   : > { %2052 = vst.msk [vmem:[#allocation2 + $0xa0] sm:$0xff] %vm407_vm2, %v2020_v22  ;;  %v2023_v59 = vmax.f32 %v1991_v23, 0.0  ;;  %v1990_v60 = vadd.f32 %v5001_v43, %v1906_v55  ;;  %v1921_v61 = vadd.f32 %v4387_v56, %v4978_v25  ;;  %4423 = vmatprep.mubr.msk.f32.mxu0 %vm407_vm2, %v5126_v58  ;;  %4476 = vmatprep.mubr.msk.f32.mxu1 %vm407_vm2, %v5126_v58 }
 0x126   : > { %v1915_v63 = vpop.f32.mrf.mxu1  ;;  %4424 = vmatmul.mubr.msk.f32.gmra.mxu0 %vm407_vm2, %v5135_v62  ;;  %4477 = vmatmul.mubr.msk.f32.gmra.mxu1 %vm407_vm2, %v5135_v62  ;;  %v5153_v10 = vld [vmem:[#allocation2 + $0x98] sm:$0xff] }
 0x127   : > { %2055 = vst.msk [vmem:[#allocation2 + $0xb8] sm:$0xff] %vm407_vm2, %v2023_v59  ;;  %v2022_v24 = vmax.f32 %v1990_v60, 0.0  ;;  %v1993_v25 = vadd.f32 %v5001_v43, %v1921_v61  ;;  %v1916_v1 = vadd.f32 %v1915_v63, %v4980_v27 }
 0x128   : > { %v4390_v4 = vpop.f32.mrf.mxu1  ;;  %v5144_v5 = vld [vmem:[#allocation2 + $0x90] sm:$0xff] }
 0x129   : > { %2054 = vst.msk [vmem:[#allocation2 + $0xb0] sm:$0xff] %vm407_vm2, %v2022_v24  ;;  %v2025_v7 = vmax.f32 %v1993_v25, 0.0  ;;  %v1992_v8 = vadd.f32 %v5001_v43, %v1916_v1  ;;  %v1931_v9 = vadd.f32 %v4390_v4, %v4982_v29  ;;  %4426 = vmatprep.mubr.msk.f32.mxu0 %vm407_vm2, %v5144_v5  ;;  %4479 = vmatprep.mubr.msk.f32.mxu1 %vm407_vm2, %v5144_v5 }
 0x12a   : > { %v1925_v11 = vpop.f32.mrf.mxu1  ;;  %4427 = vmatmul.mubr.msk.f32.gmra.mxu0 %vm407_vm2, %v5153_v10  ;;  %4480 = vmatmul.mubr.msk.f32.gmra.mxu1 %vm407_vm2, %v5153_v10  ;;  %v5171_v18 = vld [vmem:[#allocation2 + $0xa8] sm:$0xff] }
 0x12b   : > { %2057 = vst.msk [vmem:[#allocation2 + $0xc8] sm:$0xff] %vm407_vm2, %v2025_v7  ;;  %v2024_v27 = vmax.f32 %v1992_v8, 0.0  ;;  %v1995_v29 = vadd.f32 %v5001_v43, %v1931_v9  ;;  %v1926_v12 = vadd.f32 %v1925_v11, %v4984_v31 }
 0x12c   : > { %v4393_v21 = vpop.f32.mrf.mxu1  ;;  %v5162_v40 = vld [vmem:[#allocation2 + $0xa0] sm:$0xff] }
 0x12d   : > { %2056 = vst.msk [vmem:[#allocation2 + $0xc0] sm:$0xff] %vm407_vm2, %v2024_v27  ;;  %v2027_v15 = vmax.f32 %v1995_v29, 0.0  ;;  %v1994_v26 = vadd.f32 %v5001_v43, %v1926_v12  ;;  %v1941_v28 = vadd.f32 %v4393_v21, %v4986_v32  ;;  %4429 = vmatprep.mubr.msk.f32.mxu0 %vm407_vm2, %v5162_v40  ;;  %4482 = vmatprep.mubr.msk.f32.mxu1 %vm407_vm2, %v5162_v40 }
 0x12e   : > { %v1935_v30 = vpop.f32.mrf.mxu1  ;;  %4430 = vmatmul.mubr.msk.f32.gmra.mxu0 %vm407_vm2, %v5171_v18  ;;  %4483 = vmatmul.mubr.msk.f32.gmra.mxu1 %vm407_vm2, %v5171_v18  ;;  %v5189_v20 = vld [vmem:[#allocation2 + $0xb8] sm:$0xff] }
 0x12f   : > { %2059 = vst.msk [vmem:[#allocation2 + $0xd8] sm:$0xff] %vm407_vm2, %v2027_v15  ;;  %v2026_v31 = vmax.f32 %v1994_v26, 0.0  ;;  %v1997_v32 = vadd.f32 %v5001_v43, %v1941_v28  ;;  %v1936_v2 = vadd.f32 %v1935_v30, %v4988_v34 }
 0x130   : > { %v4396_v35 = vpop.f32.mrf.mxu1  ;;  %v5180_v38 = vld [vmem:[#allocation2 + $0xb0] sm:$0xff] }
 0x131   : > { %2058 = vst.msk [vmem:[#allocation2 + $0xd0] sm:$0xff] %vm407_vm2, %v2026_v31  ;;  %v2029_v42 = vmax.f32 %v1997_v32, 0.0  ;;  %v1996_v45 = vadd.f32 %v5001_v43, %v1936_v2  ;;  %v1951_v19 = vadd.f32 %v4396_v35, %v4990_v36  ;;  %4432 = vmatprep.mubr.msk.f32.mxu0 %vm407_vm2, %v5180_v38  ;;  %4485 = vmatprep.mubr.msk.f32.mxu1 %vm407_vm2, %v5180_v38 }
 0x132   : > { %v1945_v46 = vpop.f32.mrf.mxu1  ;;  %4433 = vmatmul.mubr.msk.f32.gmra.mxu0 %vm407_vm2, %v5189_v20  ;;  %4486 = vmatmul.mubr.msk.f32.gmra.mxu1 %vm407_vm2, %v5189_v20  ;;  %v2091_v23 = vld [vmem:[#allocation2 + $0xc8] sm:$0xff] }
 0x133   : > { %2061 = vst.msk [vmem:[#allocation2 + $0xe8] sm:$0xff] %vm407_vm2, %v2029_v42  ;;  %v2028_v34 = vmax.f32 %v1996_v45, 0.0  ;;  %v1999_v36 = vadd.f32 %v5001_v43, %v1951_v19  ;;  %v1946_v48 = vadd.f32 %v1945_v46, %v4992_v37  ;;  %v425_v46 = vlaneseq }
 0x134   : > { %v4399_v49 = vpop.f32.mrf.mxu1  ;;  %v5198_v50 = vld [vmem:[#allocation2 + $0xc0] sm:$0xff] }
 0x135   : > { %2060 = vst.msk [vmem:[#allocation2 + $0xe0] sm:$0xff] %vm407_vm2, %v2028_v34  ;;  %v2031_v51 = vmax.f32 %v1999_v36, 0.0  ;;  %v1998_v54 = vadd.f32 %v5001_v43, %v1946_v48  ;;  %v1961_v22 = vadd.f32 %v4399_v49, %v4994_v39  ;;  %4435 = vmatprep.mubr.msk.f32.mxu0 %vm407_vm2, %v5198_v50  ;;  %4488 = vmatprep.mubr.msk.f32.mxu1 %vm407_vm2, %v5198_v50  ;;  %v5363_v49 = vshrl.u32 %v425_v46, 7 }
 0x136   : > { %v1955_v55 = vpop.f32.mrf.mxu1  ;;  %4436 = vmatmul.mubr.msk.f32.gmra.mxu0 %vm407_vm2, %v2091_v23  ;;  %4489 = vmatmul.mubr.msk.f32.gmra.mxu1 %vm407_vm2, %v2091_v23  ;;  %v2093_v63 = vld [vmem:[#allocation2 + $0xd8] sm:$0xff] }
 0x137   : > { %2063 = vst.msk [vmem:[#allocation2 + $0xf8] sm:$0xff] %vm407_vm2, %v2031_v51  ;;  %v2030_v37 = vmax.f32 %v1998_v54, 0.0  ;;  %v2001_v56 = vadd.f32 %v5001_v43, %v1961_v22  ;;  %v1956_v59 = vadd.f32 %v1955_v55, %v4996_v41  ;;  %v428_v22 = vadd.s32 16, %v5363_v49 }
 0x138   : > { %v2092_v39 = vld [vmem:[#allocation2 + $0xd0] sm:$0xff]  ;;  %v435_v46 = vadd.s32 72, %v5363_v49  ;;  %v438_v14 = vadd.s32 96, %v5363_v49 }
 0x139   : > { %2062 = vst.msk [vmem:[#allocation2 + $0xf0] sm:$0xff] %vm407_vm2, %v2030_v37  ;;  %v2033_v60 = vmax.f32 %v2001_v56, 0.0  ;;  %v2000_v61 = vadd.f32 %v5001_v43, %v1956_v59  ;;  %4438 = vmatprep.mubr.msk.f32.mxu0 %vm407_vm2, %v2092_v39  ;;  %4491 = vmatprep.mubr.msk.f32.mxu1 %vm407_vm2, %v2092_v39  ;;  %v430_v37 = vadd.s32 32, %v5363_v49  ;;  %v429_v59 = vadd.s32 24, %v5363_v49 }
 0x13a   : > { %4439 = vmatmul.mubr.msk.f32.gmra.mxu0 %vm407_vm2, %v2093_v63  ;;  %4492 = vmatmul.mubr.msk.f32.gmra.mxu1 %vm407_vm2, %v2093_v63  ;;  %v2095_v41 = vld [vmem:[#allocation2 + $0xe8] sm:$0xff] }
 0x13b   : > { %2065 = vst.msk [vmem:[#allocation2 + $0x108] sm:$0xff] %vm407_vm2, %v2033_v60  ;;  %v2032_v24 = vmax.f32 %v2000_v61, 0.0  ;;  %v431_v60 = vadd.s32 40, %v5363_v49 }
 0x13c   : > { %v2094_v25 = vld [vmem:[#allocation2 + $0xe0] sm:$0xff] }
 0x13d   : > { %2064 = vst.msk [vmem:[#allocation2 + $0x100] sm:$0xff] %vm407_vm2, %v2032_v24  ;;  %4441 = vmatprep.mubr.msk.f32.mxu0 %vm407_vm2, %v2094_v25  ;;  %4494 = vmatprep.mubr.msk.f32.mxu1 %vm407_vm2, %v2094_v25 }
 0x13e   : > { %4442 = vmatmul.mubr.msk.f32.gmra.mxu0 %vm407_vm2, %v2095_v41  ;;  %4495 = vmatmul.mubr.msk.f32.gmra.mxu1 %vm407_vm2, %v2095_v41  ;;  %v2097_v1 = vld [vmem:[#allocation2 + $0xf8] sm:$0xff] }
 0x140   : > { %v2096_v43 = vld [vmem:[#allocation2 + $0xf0] sm:$0xff] }
 0x141   : > { %4444 = vmatprep.mubr.msk.f32.mxu0 %vm407_vm2, %v2096_v43  ;;  %4497 = vmatprep.mubr.msk.f32.mxu1 %vm407_vm2, %v2096_v43 }
 0x142   : > { %4445 = vmatmul.mubr.msk.f32.gmra.mxu0 %vm407_vm2, %v2097_v1  ;;  %4498 = vmatmul.mubr.msk.f32.gmra.mxu1 %vm407_vm2, %v2097_v1  ;;  %v2099_v7 = vld [vmem:[#allocation2 + $0x108] sm:$0xff] }
 0x144   : > { %v2098_v4 = vld [vmem:[#allocation2 + $0x100] sm:$0xff] }
 0x145   : > { %4447 = vmatprep.mubr.msk.f32.mxu0 %vm407_vm2, %v2098_v4 }
 0x146   : > { %4448 = vmatmul.mubr.msk.f32.gmra.mxu0 %vm407_vm2, %v2099_v7 }
 0x147   : > { %4502 = vmatprep.mubr.msk.f32.mxu0 %vm407_vm2, %v5024_v3  ;;  %v2682_v3 = vld [vmem:[#allocation2 + $0x110] sm:$0xff] }
 0x14a   : > { %4503 = vmatmul.mubr.msk.f32.vlgmr.msra.gmra.mxu0 %vm407_vm2, %v5032_v47  ;;  %v2683_v47 = vld [vmem:[#allocation2 + $0x118] sm:$0xff] }
 0x14b   : > { %4505 = vmatprep.mubr.msk.f32.mxu0 %vm407_vm2, %v5040_v53  ;;  %v4129_v53 = vld [vmem:[%s6452_s10] ss:$0 sm:$0xff] }
 0x14c   : > { %3654 = vrot.lane.b32.xlu0 %v4129_v53, %s4572_s12  ;;  %v436_v53 = vadd.s32 80, %v5363_v49 }
 0x14e   : > { %4506 = vmatmul.mubr.msk.f32.gmra.mxu0 %vm407_vm2, %v5048_v57  ;;  %v5287_v57 = vpop.f32.mrf.mxu1 }
 0x14f   : > { %4508 = vmatprep.mubr.msk.f32.mxu0 %vm407_vm2, %v5056_v0 }
 0x150   : > { %v5289_v0 = vpop.f32.mrf.mxu1 }
 0x152   : > { %4509 = vmatmul.mubr.msk.f32.gmra.mxu0 %vm407_vm2, %v5064_v6 }
 0x153   : > { %4511 = vmatprep.mubr.msk.f32.mxu0 %vm407_vm2, %v5072_v13 }
 0x156   : > { %4512 = vmatmul.mubr.msk.f32.gmra.mxu0 %vm407_vm2, %v5081_v16 }
 0x157   : > { %4514 = vmatprep.mubr.msk.f32.mxu0 %vm407_vm2, %v5090_v33 }
 0x15a   : > { %4515 = vmatmul.mubr.msk.f32.gmra.mxu0 %vm407_vm2, %v5099_v44 }
 0x15b   : > { %4517 = vmatprep.mubr.msk.f32.mxu0 %vm407_vm2, %v5108_v17 }
 0x15e   : > { %4518 = vmatmul.mubr.msk.f32.gmra.mxu0 %vm407_vm2, %v5117_v52 }
 0x15f   : > { %4520 = vmatprep.mubr.msk.f32.mxu0 %vm407_vm2, %v5126_v58 }
 0x162   : > { %4521 = vmatmul.mubr.msk.f32.gmra.mxu0 %vm407_vm2, %v5135_v62 }
 0x163   : > { %4523 = vmatprep.mubr.msk.f32.mxu0 %vm407_vm2, %v5144_v5 }
 0x166   : > { %4524 = vmatmul.mubr.msk.f32.gmra.mxu0 %vm407_vm2, %v5153_v10 }
 0x167   : > { %4526 = vmatprep.mubr.msk.f32.mxu0 %vm407_vm2, %v5162_v40 }
 0x16a   : > { %4527 = vmatmul.mubr.msk.f32.gmra.mxu0 %vm407_vm2, %v5171_v18 }
 0x16b   : > { %4529 = vmatprep.mubr.msk.f32.mxu0 %vm407_vm2, %v5180_v38 }
 0x16e   : > { %4530 = vmatmul.mubr.msk.f32.gmra.mxu0 %vm407_vm2, %v5189_v20 }
 0x16f   : > { %4532 = vmatprep.mubr.msk.f32.mxu0 %vm407_vm2, %v5198_v50 }
 0x172   : > { %4533 = vmatmul.mubr.msk.f32.gmra.mxu0 %vm407_vm2, %v2091_v23  ;;  %v427_v23 = vadd.s32 8, %v5363_v49 }
 0x173   : > { %4535 = vmatprep.mubr.msk.f32.mxu0 %vm407_vm2, %v2092_v39  ;;  %v432_v39 = vadd.s32 48, %v5363_v49 }
 0x174   : > { %v469_v24 = vand.u32 15, %v427_v23 }
 0x176   : > { %4536 = vmatmul.mubr.msk.f32.gmra.mxu0 %vm407_vm2, %v2093_v63  ;;  %v476_v63 = vand.u32 15, %v428_v22  ;;  %vm5398_vm4 = vcmp.le.s32.totalorder %v469_v24, 14 }
 0x177   : > { %4538 = vmatprep.mubr.msk.f32.mxu0 %vm407_vm2, %v2094_v25 }
 0x178   : > { %vm5394_vm3 = vcmp.ge.s32.totalorder %v476_v63, 1 }
 0x17a   : > { %4539 = vmatmul.mubr.msk.f32.gmra.mxu0 %vm407_vm2, %v2095_v41  ;;  %v490_v41 = vand.u32 15, %v430_v37 }
 0x17b   : > { %4541 = vmatprep.mubr.msk.f32.mxu0 %vm407_vm2, %v2096_v43  ;;  %v434_v43 = vadd.s32 64, %v5363_v49 }
 0x17c   : > { %vm5404_vm5 = vcmp.ge.s32.totalorder %v490_v41, 1  ;;  %v532_v41 = vand.u32 15, %v436_v53 }
 0x17e   : > { %4542 = vmatmul.mubr.msk.f32.gmra.mxu0 %vm407_vm2, %v2097_v1  ;;  %v433_v1 = vadd.s32 56, %v5363_v49  ;;  %vm5462_vm12 = vcmp.ge.s32.totalorder %v532_v41, 1 }
 0x17f   : > { %4544 = vmatprep.mubr.msk.f32.mxu0 %vm407_vm2, %v2098_v4 }
 0x182   : > { %4545 = vmatmul.mubr.msk.f32.gmra.mxu0 %vm407_vm2, %v2099_v7  ;;  %v483_v7 = vand.u32 15, %v429_v59 }
 0x183   : > { %4547 = vmatprep.mubr.msk.f32.mxu0 %vm407_vm2, %v2682_v3  ;;  %v504_v3 = vand.u32 15, %v432_v39  ;;  %v518_v39 = vand.u32 15, %v434_v43  ;;  %v546_v43 = vand.u32 15, %v438_v14 }
 0x184   : > { %vm5411_vm6 = vcmp.le.s32.totalorder %v483_v7, 14  ;;  %v6510_v7 = vmov 0.0  }
 0x185   : > { %vm5415_vm7 = vcmp.ge.s32.totalorder %v504_v3, 1  ;;  %v5430_v3 = vsel %vm5394_vm3, 1.0, %v6510_v7  ;;  %v5440_v14 = vsel %vm5404_vm5, 1.0, %v6510_v7  ;;  %vm850_vm9 = vcmp.ge.s32.totalorder %v518_v39, 1 }
 0x186   : > { %4548 = vmatmul.mubr.msk.f32.gmra.mxu0 %vm407_vm2, %v2683_v47  ;;  %v497_v47 = vand.u32 15, %v431_v60  ;;  %v511_v60 = vand.u32 15, %v433_v1  ;;  %v440_v1 = vadd.s32 112, %v5363_v49  ;;  %v5450_v37 = vsel %vm5411_vm6, 1.0, %v6510_v7 }
 0x187   : > { %v5455_v59 = vsel %vm5415_vm7, 1.0, %v6510_v7  ;;  %vm5470_vm14 = vcmp.ge.s32.totalorder %v546_v43, 1 }
 0x188   : > { %vm5419_vm8 = vcmp.le.s32.totalorder %v497_v47, 14  ;;  %v5435_v47 = vsel %vm5398_vm4, 1.0, %v6510_v7  ;;  %vm945_vm10 = vcmp.le.s32.totalorder %v511_v60, 14  ;;  %v560_v24 = vand.u32 15, %v440_v1 }
 0x189   : > { %v5460_v39 = vsel %vm5419_vm8, 1.0, %v6510_v7  ;;  %v5480_v41 = vsel %vm945_vm10, 1.0, %v6510_v7  ;;  %v5513_v60 = vadd.s32 120, %v5363_v49 }
 0x18a   : > { %6513 = vst [vmem:[#allocation15_spill] sm:$0xff] %v5460_v39  ;;  %6522 = vst [vmem:[#allocation18_spill] sm:$0xff] %v5480_v41  ;;  %v444_v39 = vadd.s32 144, %v5363_v49  ;;  %vm856_vm1 = vcmp.ge.s32.totalorder %v560_v24, 1 }
 0x18b   : > { %6529 = vst [vmem:[#allocation25_spill] sm:$0xff] %v5513_v60  ;;  %v450_v60 = vadd.s32 192, %v5363_v49 }
 0x1ca   : > { %v5291_v6 = vpop.f32.mrf.mxu0  ;;  %v5293_v13 = vpop.f32.mrf.mxu1 }
 0x1cb   : > { %v2499_v43 = vadd.f32 %v5287_v57, %v5291_v6  ;;  %v5502_v57 = vsel %vm5470_vm14, 1.0, %v6510_v7  ;;  %v445_v6 = vadd.s32 152, %v5363_v49 }
 0x1cc   : > { %v5295_v16 = vpop.f32.mrf.mxu0  ;;  %v5297_v33 = vpop.f32.mrf.mxu1  ;;  %6526 = vst [vmem:[#allocation22_spill] sm:$0xff] %v5502_v57 }
 0x1cd   : > { %v595_v24 = vand.u32 15, %v445_v6 }
 0x1ce   : > { %v5299_v44 = vpop.f32.mrf.mxu0  ;;  %v5301_v17 = vpop.f32.mrf.mxu1 }
 0x1cf   : > { %v2509_v57 = vadd.f32 %v5293_v13, %v5299_v44  ;;  %vm5555_vm7 = vcmp.le.s32.totalorder %v595_v24, 14 }
 0x1d0   : > { %v5303_v52 = vpop.f32.mrf.mxu0  ;;  %v5305_v58 = vpop.f32.mrf.mxu1 }
 0x1d2   : > { %v5307_v62 = vpop.f32.mrf.mxu0  ;;  %v5309_v5 = vpop.f32.mrf.mxu1 }
 0x1d3   : > { %v2519_v24 = vadd.f32 %v5301_v17, %v5307_v62 }
 0x1d4   : > { %v5311_v8 = vpop.f32.mrf.mxu0  ;;  %v5313_v9 = vpop.f32.mrf.mxu1 }
 0x1d6   : > { %v5315_v10 = vpop.f32.mrf.mxu0  ;;  %v5317_v11 = vpop.f32.mrf.mxu1 }
 0x1d8   : > { %v5319_v27 = vpop.f32.mrf.mxu0  ;;  %v5321_v29 = vpop.f32.mrf.mxu1 }
 0x1da   : > { %v5323_v12 = vpop.f32.mrf.mxu0  ;;  %v5327_v40 = vpop.f32.mrf.mxu1 }
 0x1dc   : > { %v5325_v21 = vpop.f32.mrf.mxu0  ;;  %v5333_v28 = vpop.f32.mrf.mxu1 }
 0x1de   : > { %v5329_v15 = vpop.f32.mrf.mxu0  ;;  %v5339_v31 = vpop.f32.mrf.mxu1 }
 0x1e0   : > { %v5331_v26 = vpop.f32.mrf.mxu0  ;;  %v5345_v35 = vpop.f32.mrf.mxu1 }
 0x1e2   : > { %v5335_v18 = vpop.f32.mrf.mxu0  ;;  %v5351_v45 = vpop.f32.mrf.mxu1 }
 0x1e4   : > { %v5337_v30 = vpop.f32.mrf.mxu0  ;;  %v5357_v34 = vpop.f32.mrf.mxu1 }
 0x1e6   : > { %v5341_v32 = vpop.f32.mrf.mxu0  ;;  %v5365_v50 = vpop.f32.mrf.mxu1 }
 0x1e8   : > { %v5343_v2 = vpop.f32.mrf.mxu0  ;;  %v5373_v55 = vpop.f32.mrf.mxu1 }
 0x1ea   : > { %v5347_v38 = vpop.f32.mrf.mxu0  ;;  %v5383_v25 = vpop.f32.mrf.mxu1 }
 0x1ec   : > { %v5349_v42 = vpop.f32.mrf.mxu0 }
 0x1ee   : > { %v5353_v19 = vpop.f32.mrf.mxu0 }
 0x1f0   : > { %v5355_v20 = vpop.f32.mrf.mxu0 }
 0x1f2   : > { %v5359_v36 = vpop.f32.mrf.mxu0 }
 0x1f3   : > { %6488 = vst [vmem:[#allocation3_spill] sm:$0xff] %v5359_v36 }
 0x1f4   : > { %v5361_v48 = vpop.f32.mrf.mxu0 }
 0x1f5   : > { %6489 = vst [vmem:[#allocation4_spill] sm:$0xff] %v5361_v48 }
 0x1f6   : > { %v5367_v51 = vpop.f32.mrf.mxu0 }
 0x1f7   : > { %6490 = vst [vmem:[#allocation5_spill] sm:$0xff] %v5367_v51  ;;  %v439_v51 = vadd.s32 104, %v5363_v49 }
 0x1f8   : > { %v5369_v54 = vpop.f32.mrf.mxu0 }
 0x1f9   : > { %6491 = vst [vmem:[#allocation6_spill] sm:$0xff] %v5369_v54  ;;  %v525_v54 = vand.u32 15, %v435_v46 }
 0x1fa   : > { %v5376_v56 = vpop.f32.mrf.mxu0 }
 0x1fb   : > { %6492 = vst [vmem:[#allocation7_spill] sm:$0xff] %v5376_v56  ;;  %vm5466_vm13 = vcmp.le.s32.totalorder %v525_v54, 14  ;;  %v443_v54 = vadd.s32 136, %v5363_v49 }
 0x1fc   : > { %v5381_v61 = vpop.f32.mrf.mxu0  ;;  %v5497_v41 = vsel %vm5466_vm13, 1.0, %v6510_v7 }
 0x1fd   : > { %6493 = vst [vmem:[#allocation8_spill] sm:$0xff] %v5381_v61  ;;  %v437_v61 = vadd.s32 88, %v5363_v49  ;;  %6525 = vst [vmem:[#allocation21_spill] sm:$0xff] %v5497_v41  ;;  %v588_v41 = vand.u32 15, %v444_v39  ;;  %v581_v63 = vand.u32 15, %v443_v54  ;;  %v448_v39 = vadd.s32 176, %v5363_v49 }
 0x1fe   : > { %v5387_v4 = vpop.f32.mrf.mxu0  ;;  %v2504_v54 = vadd.f32 %v5297_v33, %v5303_v52 }
 0x1ff   : > { %6494 = vst [vmem:[#allocation9_spill] sm:$0xff] %v5387_v4  ;;  %v5402_v4 = vpop.f32.mrf.mxu1  ;;  %v539_v46 = vand.u32 15, %v437_v61  ;;  %vm5538_vm4 = vcmp.ge.s32.totalorder %v588_v41, 1  ;;  %vm5542_vm5 = vcmp.le.s32.totalorder %v581_v63, 14  ;;  %v616_v63 = vand.u32 15, %v448_v39 }
 0x200   : > { %v5392_v22 = vpop.f32.mrf.mxu0  ;;  %v5571_v39 = vsel %vm5538_vm4, 1.0, %v6510_v7  ;;  %v5576_v52 = vsel %vm5542_vm5, 1.0, %v6510_v7 }
 0x201   : > { %6495 = vst [vmem:[#allocation10_spill] sm:$0xff] %v5392_v22  ;;  %v5442_v53 = vpop.f32.mrf.mxu1  ;;  %v5477_v22 = vsel %vm850_vm9, 1.0, %v6510_v7  ;;  %vm949_vm15 = vcmp.le.s32.totalorder %v539_v46, 14  ;;  %6542 = vst [vmem:[#allocation32_spill] sm:$0xff] %v5571_v39  ;;  %vm864_vm8 = vcmp.ge.s32.totalorder %v616_v63, 1 }
 0x202   : > { %v5409_v56 = vpop.f32.mrf.mxu0  ;;  %6511 = vst [vmem:[#allocation13_spill] sm:$0xff] %v5442_v53  ;;  %6521 = vst [vmem:[#allocation17_spill] sm:$0xff] %v5477_v22  ;;  %v5492_v22 = vsel %vm5462_vm12, 1.0, %v6510_v7 }
 0x203   : > { %6502 = vst [vmem:[#allocation11_spill] sm:$0xff] %v5409_v56  ;;  %v5486_v53 = vpop.f32.mrf.mxu1  ;;  %6524 = vst [vmem:[#allocation20_spill] sm:$0xff] %v5492_v22  ;;  %v5510_v22 = vsel %vm949_vm15, 1.0, %v6510_v7 }
 0x204   : > { %v5425_v56 = vpop.f32.mrf.mxu0  ;;  %6523 = vst [vmem:[#allocation19_spill] sm:$0xff] %v5486_v53  ;;  %6528 = vst [vmem:[#allocation24_spill] sm:$0xff] %v5510_v22  ;;  %v630_v22 = vand.u32 15, %v450_v60  ;;  %v5617_v60 = vsel %vm864_vm8, 1.0, %v6510_v7 }
 0x205   : > { %6509 = vst [vmem:[#allocation12_spill] sm:$0xff] %v5425_v56  ;;  %v442_v56 = vadd.s32 128, %v5363_v49  ;;  %v5517_v53 = vpop.f32.mrf.mxu1  ;;  %6543 = vst [vmem:[#allocation33_spill] sm:$0xff] %v5576_v52 }
 0x206   : > { %v5445_v23 = vpop.f32.mrf.mxu0  ;;  %6549 = vst [vmem:[#allocation38_spill] sm:$0xff] %v5617_v60  ;;  %vm5627_vm10 = vcmp.ge.s32.totalorder %v630_v22, 1 }
 0x207   : > { %6512 = vst [vmem:[#allocation14_spill] sm:$0xff] %v5445_v23  ;;  %v553_v23 = vand.u32 15, %v439_v51  ;;  %v574_v1 = vand.u32 15, %v442_v56  ;;  %v446_v51 = vadd.s32 160, %v5363_v49  ;;  %v2494_v56 = vadd.f32 %v5289_v0, %v5295_v16  ;;  %v5546_v33 = vpop.f32.mrf.mxu1 }
 0x208   : > { %v5474_v48 = vpop.f32.mrf.mxu0 }
 0x209   : > { %6520 = vst [vmem:[#allocation16_spill] sm:$0xff] %v5474_v48  ;;  %vm951_vm2 = vcmp.le.s32.totalorder %v553_v23, 14  ;;  %vm858_vm3 = vcmp.ge.s32.totalorder %v574_v1, 1  ;;  %v602_v0 = vand.u32 15, %v446_v51 }
 0x20a   : > { %v4504_v48 = vpop.f32.mrf.mxu0  ;;  %v5525_v23 = vsel %vm951_vm2, 1.0, %v6510_v7  ;;  %v5535_v51 = vsel %vm858_vm3, 1.0, %v6510_v7 }
 0x20b   : > { %v5507_v46 = vadd.f32 %v4504_v48, %v2499_v43  ;;  %v5522_v48 = vsel %vm856_vm1, 1.0, %v6510_v7  ;;  %6532 = vst [vmem:[#allocation28_spill] sm:$0xff] %v5525_v23  ;;  %6534 = vst [vmem:[#allocation30_spill] sm:$0xff] %v5535_v51  ;;  %vm862_vm6 = vcmp.ge.s32.totalorder %v602_v0, 1  ;;  %v447_v51 = vadd.s32 168, %v5363_v49 }
 0x20c   : > { %v2846_v61 = vpop.f32.mrf.mxu0  ;;  %6531 = vst [vmem:[#allocation27_spill] sm:$0xff] %v5522_v48 }
 0x20d   : > { %6527 = vst [vmem:[#allocation23_spill] sm:$0xff] %v5507_v46  ;;  %v5519_v36 = vadd.f32 %v2846_v61, %v2494_v56  ;;  %v3073_v13 = vrot.slane %v5507_v46, 7 }
 0x20e   : > { %v4507_v16 = vpop.f32.mrf.mxu0 }
 0x20f   : > { %6530 = vst [vmem:[#allocation26_spill] sm:$0xff] %v5519_v36  ;;  %v6457_v44 = vrot.slane %v5519_v36, 7  ;;  %v5532_v43 = vadd.f32 %v4507_v16, %v2509_v57  ;;  %v6546_v17 = vrot.slane %v5519_v36, 1 }
 0x210   : > { %v2856_v1 = vpop.f32.mrf.mxu0 }
 0x211   : > { %6533 = vst [vmem:[#allocation29_spill] sm:$0xff] %v5532_v43  ;;  %v5549_v57 = vadd.f32 %v2856_v1, %v2504_v54  ;;  %v3074_v16 = vsel %vm3071_vm11, %v6457_v44, %v3073_v13  ;;  %v2514_v54 = vadd.f32 %v5305_v58, %v5311_v8  ;;  %v3169_v1 = vrot.slane %v5507_v46, 1  ;;  %v5581_v8 = vpop.f32.mrf.mxu1 }
 0x212   : > { %3331 = vrot.lane.b32.xlu0 %v3074_v16, %s4572_s12  ;;  %v4510_v41 = vpop.f32.mrf.mxu0  ;;  %v3077_v0 = vrot.slane %v5532_v43, 7  ;;  %v5579_v58 = vsel %vm862_vm6, 1.0, %v6510_v7 }
 0x213   : > { %6539 = vst [vmem:[#allocation31_spill] sm:$0xff] %v5549_v57  ;;  %v3075_v44 = vrot.slane %v5549_v57, 7  ;;  %6544 = vst [vmem:[#allocation34_spill] sm:$0xff] %v5579_v58  ;;  %v3171_v46 = vrot.slane %v5549_v57, 1  ;;  %v3170_v62 = vsel %vm3167_vm0, %v6546_v17, %v3169_v1  ;;  %v5596_v57 = vsel %vm5555_vm7, 1.0, %v6510_v7  ;;  %v5606_v56 = vpop.f32.mrf.mxu1 }
 0x214   : > { %v2866_v16 = vpop.f32.mrf.mxu0  ;;  %6547 = vst [vmem:[#allocation36_spill] sm:$0xff] %v5596_v57  ;;  %v3173_v17 = vrot.slane %v5532_v43, 1  ;;  %v5600_v36 = vadd.f32 %v4510_v41, %v2519_v24  ;;  %v452_v58 = vadd.s32 208, %v5363_v49  ;;  %6548 = vst [vmem:[#allocation37_spill] sm:$0xff] %v5606_v56  ;;  %v453_v43 = vadd.s32 216, %v5363_v49 }
 0x215   : > { %v5584_v23 = vadd.f32 %v2866_v16, %v2514_v54  ;;  %v3078_v61 = vsel %vm3071_vm11, %v3075_v44, %v3077_v0  ;;  %v3076_v48 = vsel %vm3071_vm11, %v3073_v13, %v3075_v44  ;;  %v609_v54 = vand.u32 15, %v447_v51  ;;  %v5635_v56 = vpop.f32.mrf.mxu1 }
 0x216   : > { %3521 = vrot.lane.b32.xlu0 %v3170_v62, %s4573_s13  ;;  %3335 = vrot.lane.b32.xlu1 %v3078_v61, %s4572_s12  ;;  %v4513_v6 = vpop.f32.mrf.mxu0  ;;  %v449_v16 = vadd.s32 184, %v5363_v49  ;;  %v3267_v61 = vmul.f32 %v5430_v3, %v3076_v48  ;;  %v451_v13 = vadd.s32 200, %v5363_v49  ;;  %v454_v44 = vadd.s32 224, %v5363_v49 }
 0x217   : > { %6545 = vst [vmem:[#allocation35_spill] sm:$0xff] %v5584_v23  ;;  %v3079_v51 = vrot.slane %v5584_v23, 7  ;;  %v3175_v57 = vrot.slane %v5584_v23, 1  ;;  %v3174_v41 = vsel %vm3167_vm0, %v3171_v46, %v3173_v17  ;;  %v3172_v63 = vsel %vm3167_vm0, %v3169_v1, %v3171_v46  ;;  %v5680_v1 = vpop.f32.mrf.mxu1 }
 0x218   : > { %v2876_v62 = vpop.f32.mrf.mxu0  ;;  %vm5619_vm9 = vcmp.le.s32.totalorder %v609_v54, 14  ;;  %v623_v24 = vand.u32 15, %v449_v16  ;;  %v2524_v23 = vadd.f32 %v5313_v9, %v5319_v27  ;;  %v3177_v46 = vrot.slane %v5600_v36, 1 }
 0x219   : > { %v3458_v54 = vmul.f32 %v5435_v47, %v3172_v63  ;;  %v644_v60 = vand.u32 15, %v452_v58  ;;  %v637_v52 = vand.u32 15, %v451_v13  ;;  %v658_v39 = vand.u32 15, %v454_v44 }
 0x21a   : > { %3525 = vrot.lane.b32.xlu0 %v3174_v41, %s4573_s13  ;;  %3333 = vrot.lane.b32.xlu1 %v3267_v61, %s4572_s12  ;;  %v5614_v3 = vpop.f32.mrf.mxu0  ;;  %v457_v61 = vadd.s32 248, %v5363_v49  ;;  %v2529_v16 = vadd.f32 %v5309_v5, %v5315_v10  ;;  %v5637_v9 = vadd.f32 %v2876_v62, %v2524_v23  ;;  %v3178_v27 = vsel %vm3167_vm0, %v3175_v57, %v3177_v46 }
 0x21b   : > { %v3080_v22 = vsel %vm3071_vm11, %v3077_v0, %v3079_v51  ;;  %v5650_v5 = vsel %vm5619_vm9, 1.0, %v6510_v7  ;;  %vm5652_vm12 = vcmp.le.s32.totalorder %v623_v24, 14  ;;  %v651_v23 = vand.u32 15, %v453_v43 }
 0x21c   : > { %v2886_v41 = vpop.f32.mrf.mxu0  ;;  %v462_v58 = vand.u32 15, %v5363_v49  ;;  %v3081_v0 = vrot.slane %v5600_v36, 7  ;;  %v5658_v62 = vadd.f32 %v4513_v6, %v2529_v16  ;;  %v5663_v13 = vsel %vm5627_vm10, 1.0, %v6510_v7 }
 0x21d   : > { %v679_v44 = vand.u32 15, %v457_v61  ;;  %v3269_v48 = vmul.f32 %v5440_v14, %v3080_v22  ;;  %vm5668_vm13 = vcmp.ge.s32.totalorder %v644_v60, 1  ;;  %vm5672_vm14 = vcmp.le.s32.totalorder %v637_v52, 14 }
 0x21e   : > { %3523 = vrot.lane.b32.xlu1 %v3458_v54, %s4573_s13  ;;  %3529 = vrot.lane.b32.xlu0 %v3178_v27, %s4573_s13  ;;  %v5645_v47 = vpop.f32.mrf.mxu0  ;;  %vm5676_vm15 = vcmp.ge.s32.totalorder %v658_v39, 1  ;;  %v3083_v61 = vrot.slane %v5637_v9, 7  ;;  %v3179_v54 = vrot.slane %v5637_v9, 1  ;;  %v3082_v14 = vsel %vm3071_vm11, %v3079_v51, %v3081_v0 }
 0x21f   : > { %v3176_v60 = vsel %vm3167_vm0, %v3173_v17, %v3175_v57  ;;  %v5693_v39 = vsel %vm5652_vm12, 1.0, %v6510_v7  ;;  %vm5695_vm1 = vcmp.le.s32.totalorder %v651_v23, 14  ;;  %vm5699_vm2 = vcmp.ge.s32.totalorder %v462_v58, 1 }
 0x220   : > { %v5665_v63 = vpop.f32.mrf.mxu0  ;;  %v456_v57 = vadd.s32 240, %v5363_v49  ;;  %v2534_v17 = vadd.f32 %v5321_v29, %v5325_v21  ;;  %v3181_v51 = vrot.slane %v5658_v62, 1  ;;  %vm5707_vm3 = vcmp.le.s32.totalorder %v679_v44, 14  ;;  %v4496_v44 = vpop.f32.mrf.mxu1 }
 0x221   : > { %v5712_v10 = vadd.s32 232, %v5363_v49  ;;  %v3460_v58 = vmul.f32 %v5450_v37, %v3176_v60  ;;  %v5725_v29 = vsel %vm5672_vm14, 1.0, %v6510_v7  ;;  %v5730_v21 = vsel %vm5676_vm15, 1.0, %v6510_v7 }
 0x222   : > { %3339 = vrot.lane.b32.xlu1 %v3082_v14, %s4572_s12  ;;  %3337 = vrot.lane.b32.xlu0 %v3269_v48, %s4572_s12  ;;  %v5688_v52 = vpop.f32.mrf.mxu0  ;;  %v5720_v48 = vsel %vm5668_vm13, 1.0, %v6510_v7  ;;  %v2539_v49 = vadd.f32 %v5317_v11, %v5323_v12  ;;  %v5734_v37 = vadd.f32 %v2886_v41, %v2534_v17  ;;  %v3182_v24 = vsel %vm3167_vm0, %v3179_v54, %v3181_v51  ;;  %v6587_v17 = vld [vmem:[#allocation14_spill] sm:$0xff] }
 0x223   : > { %v3084_v14 = vsel %vm3071_vm11, %v3081_v0, %v3083_v61  ;;  %v5747_v6 = vsel %vm5695_vm1, 1.0, %v6510_v7  ;;  %v5752_v11 = vsel %vm5699_vm2, 1.0, %v6510_v7  ;;  %v5757_v12 = vsel %vm5707_vm3, 1.0, %v6510_v7 }
 0x224   : > { %v5714_v23 = vpop.f32.mrf.mxu0  ;;  %v672_v41 = vand.u32 15, %v456_v57  ;;  %v2549_v0 = vadd.f32 %v5327_v40, %v5329_v15  ;;  %v3085_v60 = vrot.slane %v5658_v62, 7  ;;  %v5763_v16 = vadd.f32 %v5614_v3, %v2539_v49  ;;  %v2633_v15 = vpop.f32.mrf.mxu1 }
 0x225   : > { %v2544_v27 = vadd.f32 %v5333_v28, %v5331_v26  ;;  %v2554_v57 = vadd.f32 %v5345_v35, %v5337_v30  ;;  %v3271_v40 = vmul.f32 %v5455_v59, %v3084_v14  ;;  %v3087_v3 = vrot.slane %v5734_v37, 7 }
 0x226   : > { %3527 = vrot.lane.b32.xlu1 %v3460_v58, %s4573_s13  ;;  %3533 = vrot.lane.b32.xlu0 %v3182_v24, %s4573_s13  ;;  %v5742_v43 = vpop.f32.mrf.mxu0  ;;  %6568 = vst [vmem:[#allocation39_spill] sm:$0xff] %v5763_v16  ;;  %v5770_v58 = vadd.f32 %v5339_v31, %v5335_v18  ;;  %v3183_v49 = vrot.slane %v5734_v37, 1  ;;  %v3086_v24 = vsel %vm3071_vm11, %v3083_v61, %v3085_v60  ;;  %vm5795_vm4 = vcmp.ge.s32.totalorder %v672_v41, 1  ;;  %v6574_v61 = vld [vmem:[#allocation19_spill] sm:$0xff] }
 0x227   : > { %v3180_v26 = vsel %vm3167_vm0, %v3177_v46, %v3179_v54  ;;  %v5785_v28 = vadd.f32 %v5351_v45, %v5341_v32  ;;  %v5789_v18 = vadd.f32 %v5357_v34, %v5343_v2  ;;  %v2579_v30 = vadd.f32 %v5365_v50, %v5347_v38  ;;  %v6571_v34 = vld [vmem:[#allocation3_spill] sm:$0xff]  ;;  %v6572_v50 = vld [vmem:[#allocation13_spill] sm:$0xff]  ;;  %v6573_v46 = vld [vmem:[#allocation4_spill] sm:$0xff] }
 0x228   : > { %v5774_v22 = vpop.f32.mrf.mxu0  ;;  %v5801_v32 = vadd.f32 %v5373_v55, %v5349_v42  ;;  %v2589_v2 = vadd.f32 %v5383_v25, %v5353_v19  ;;  %v2584_v45 = vadd.f32 %v5402_v4, %v5355_v20  ;;  %v3185_v38 = vrot.slane %v5763_v16, 1  ;;  %v6575_v55 = vld [vmem:[#allocation15_spill] sm:$0xff]  ;;  %v6576_v19 = vld [vmem:[#allocation5_spill] sm:$0xff]  ;;  %v6577_v20 = vld [vmem:[#allocation6_spill] sm:$0xff] }
 0x229   : > { %v5810_v59 = vadd.f32 %v6572_v50, %v6571_v34  ;;  %v2594_v54 = vadd.f32 %v6574_v61, %v6573_v46  ;;  %v5815_v14 = vadd.f32 %v5665_v63, %v2544_v27  ;;  %v3462_v41 = vmul.f32 %v6575_v55, %v3180_v26  ;;  %v6578_v50 = vld [vmem:[#allocation7_spill] sm:$0xff]  ;;  %v6579_v27 = vld [vmem:[#allocation8_spill] sm:$0xff]  ;;  %v6580_v46 = vld [vmem:[#allocation37_spill] sm:$0xff] }
 0x22a   : > { %3343 = vrot.lane.b32.xlu1 %v3086_v24, %s4572_s12  ;;  %3341 = vrot.lane.b32.xlu0 %v3271_v40, %s4572_s12  ;;  %v4528_v31 = vpop.f32.mrf.mxu0  ;;  %v5822_v25 = vadd.f32 %v5517_v53, %v6576_v19  ;;  %v5826_v4 = vadd.f32 %v5546_v33, %v6577_v20  ;;  %v4499_v40 = vpop.f32.mrf.mxu1  ;;  %v3186_v24 = vsel %vm3167_vm0, %v3183_v49, %v3185_v38  ;;  %v6582_v61 = vld [vmem:[#allocation9_spill] sm:$0xff]  ;;  %v6583_v55 = vld [vmem:[#allocation10_spill] sm:$0xff] }
 0x22b   : > { %v3088_v34 = vsel %vm3071_vm11, %v3085_v60, %v3087_v3  ;;  %v5832_v63 = vadd.f32 %v5581_v8, %v6578_v50  ;;  %v5836_v26 = vadd.f32 %v6580_v46, %v6579_v27  ;;  %v5839_v53 = vadd.f32 %v5645_v47, %v2549_v0  ;;  %v6584_v47 = vld [vmem:[#allocation11_spill] sm:$0xff]  ;;  %v6585_v50 = vld [vmem:[#allocation17_spill] sm:$0xff]  ;;  %v6586_v46 = vld [vmem:[#allocation12_spill] sm:$0xff] }
 0x22c   : > { %v5817_v42 = vpop.f32.mrf.mxu0  ;;  %v5846_v60 = vsel %vm5795_vm4, 1.0, %v6510_v7  ;;  %v5850_v8 = vadd.f32 %v5635_v56, %v6582_v61  ;;  %v5854_v19 = vadd.f32 %v5680_v1, %v6583_v55  ;;  %v5857_v0 = vadd.f32 %v4496_v44, %v6584_v47  ;;  %v2643_v1 = vpop.f32.mrf.mxu1 }
 0x22d   : > { %6581 = vst [vmem:[#allocation3_spill] sm:$0xff] %v5839_v53  ;;  %v3091_v20 = vrot.slane %v5815_v14, 7  ;;  %v3273_v27 = vmul.f32 %v6585_v50, %v3088_v34  ;;  %v3184_v56 = vsel %vm3167_vm0, %v3181_v51, %v3183_v49  ;;  %v5868_v61 = vadd.f32 %v2633_v15, %v6586_v46 }
 0x22e   : > { %3531 = vrot.lane.b32.xlu1 %v3462_v41, %s4573_s13  ;;  %3537 = vrot.lane.b32.xlu0 %v3186_v24, %s4573_s13  ;;  %v4531_v33 = vpop.f32.mrf.mxu0  ;;  %v3089_v41 = vrot.slane %v5763_v16, 7  ;;  %v5861_v24 = vadd.f32 %v4528_v31, %v2579_v30  ;;  %v3187_v44 = vrot.slane %v5815_v14, 1  ;;  %v5875_v30 = vadd.f32 %v4499_v40, %v6587_v17  ;;  %v6588_v31 = vld [vmem:[#allocation16_spill] sm:$0xff] }
 0x22f   : > { %v5878_v16 = vadd.f32 %v2643_v1, %v6588_v31  ;;  %v3093_v34 = vrot.slane %v5839_v53, 7  ;;  %v5882_v51 = vadd.f32 %v5714_v23, %v2554_v57  ;;  %v3189_v49 = vrot.slane %v5839_v53, 1 }
 0x230   : > { %v2936_v35 = vpop.f32.mrf.mxu0  ;;  %v3090_v47 = vsel %vm3071_vm11, %v3087_v3, %v3089_v41  ;;  %v6469_v50 = vrot.slane %v5861_v24, 1  ;;  %v5892_v46 = vadd.f32 %v4531_v33, %v2589_v2  ;;  %v3092_v57 = vsel %vm3071_vm11, %v3089_v41, %v3091_v20 }
 0x231   : > { %v5871_v55 = vadd.f32 %v2936_v35, %v2584_v45  ;;  %v6589_v45 = vld [vmem:[#allocation18_spill] sm:$0xff]  ;;  %v6466_v35 = vrot.slane %v5861_v24, 7  ;;  %v3094_v31 = vsel %vm3071_vm11, %v3091_v20, %v3093_v34  ;;  %v3188_v33 = vsel %vm3167_vm0, %v3185_v38, %v3187_v44  ;;  %v6590_v20 = vld [vmem:[#allocation20_spill] sm:$0xff] }
 0x232   : > { %3347 = vrot.lane.b32.xlu1 %v3090_v47, %s4572_s12  ;;  %3345 = vrot.lane.b32.xlu0 %v3273_v27, %s4572_s12  ;;  %v4534_v15 = vpop.f32.mrf.mxu0  ;;  %v3464_v40 = vmul.f32 %v6589_v45, %v3184_v56  ;;  %v5897_v27 = vadd.f32 %v5688_v52, %v5770_v58  ;;  %v3190_v47 = vsel %vm3167_vm0, %v3187_v44, %v3189_v49  ;;  %v3095_v56 = vrot.slane %v5882_v51, 7 }
 0x233   : > { %v6465_v3 = vrot.slane %v5871_v55, 7  ;;  %v6468_v17 = vrot.slane %v5871_v55, 1  ;;  %v3275_v45 = vmul.f32 %v6590_v20, %v3092_v57  ;;  %v6472_v44 = vrot.slane %v5892_v46, 7 }
 0x234   : > { %v2946_v23 = vpop.f32.mrf.mxu0 }
 0x235   : > { %v5899_v1 = vadd.f32 %v2946_v23, %v2594_v54  ;;  %v3108_v52 = vsel %vm3071_vm11, %v6466_v35, %v6465_v3  ;;  %v3204_v58 = vsel %vm3167_vm0, %v6469_v50, %v6468_v17  ;;  %v6473_v23 = vrot.slane %v5892_v46, 1  ;;  %v6592_v35 = vld [vmem:[#allocation33_spill] sm:$0xff] }
 0x236   : > { %3535 = vrot.lane.b32.xlu1 %v3464_v40, %s4573_s13  ;;  %3541 = vrot.lane.b32.xlu0 %v3190_v47, %s4573_s13  ;;  %v4537_v2 = vpop.f32.mrf.mxu0  ;;  %v6591_v40 = vld [vmem:[#allocation32_spill] sm:$0xff]  ;;  %v5926_v47 = vadd.f32 %v4534_v15, %v5810_v59  ;;  %v5929_v53 = vmul.f32 %v6592_v35, %v3204_v58  ;;  %v3191_v17 = vrot.slane %v5882_v51, 1  ;;  %v5934_v50 = vadd.f32 %v5742_v43, %v5785_v28 }
 0x237   : > { %v6470_v54 = vrot.slane %v5899_v1, 7  ;;  %v6471_v41 = vrot.slane %v5899_v1, 1  ;;  %v5921_v38 = vmul.f32 %v6591_v40, %v3108_v52  ;;  %v6593_v52 = vld [vmem:[#allocation21_spill] sm:$0xff]  ;;  %v3193_v40 = vrot.slane %v5897_v27, 1 }
 0x238   : > { %v2956_v3 = vpop.f32.mrf.mxu0  ;;  %v3466_v20 = vmul.f32 %v6593_v52, %v3188_v33  ;;  %v5943_v59 = vadd.f32 %v5774_v22, %v5789_v18  ;;  %v6477_v33 = vrot.slane %v5926_v47, 1  ;;  %v5966_v58 = vadd.f32 %v4537_v2, %v5822_v25  ;;  %v6595_v52 = vld [vmem:[#allocation36_spill] sm:$0xff] }
 0x239   : > { %v5937_v57 = vadd.f32 %v2956_v3, %v5826_v4  ;;  %v3112_v43 = vsel %vm3071_vm11, %v6472_v44, %v6470_v54  ;;  %v3208_v28 = vsel %vm3167_vm0, %v6473_v23, %v6471_v41  ;;  %v3096_v4 = vsel %vm3071_vm11, %v3093_v34, %v3095_v56  ;;  %v6594_v3 = vld [vmem:[#allocation34_spill] sm:$0xff] }
 0x23a   : > { %3351 = vrot.lane.b32.xlu1 %v3094_v31, %s4572_s12  ;;  %3349 = vrot.lane.b32.xlu0 %v3275_v45, %s4572_s12  ;;  %v4540_v15 = vpop.f32.mrf.mxu0  ;;  %v5961_v35 = vmul.f32 %v6594_v3, %v3112_v43  ;;  %v6475_v31 = vrot.slane %v5926_v47, 7  ;;  %v5969_v54 = vmul.f32 %v6595_v52, %v3208_v28  ;;  %v3097_v41 = vrot.slane %v5897_v27, 7  ;;  %v6596_v52 = vld [vmem:[#allocation22_spill] sm:$0xff] }
 0x23b   : > { %v6474_v22 = vrot.slane %v5937_v57, 7  ;;  %v6476_v18 = vrot.slane %v5937_v57, 1  ;;  %v3194_v43 = vsel %vm3167_vm0, %v3191_v17, %v3193_v40  ;;  %v3099_v3 = vrot.slane %v5943_v59, 7  ;;  %v6597_v23 = vld [vmem:[#allocation38_spill] sm:$0xff] }
 0x23c   : > { %v2966_v45 = vpop.f32.mrf.mxu0  ;;  %v3192_v2 = vsel %vm3167_vm0, %v3189_v49, %v3191_v17  ;;  %v6598_v17 = vand.u32 15, %v5712_v10  ;;  %v3098_v10 = vsel %vm3071_vm11, %v3095_v56, %v3097_v41  ;;  %v6603_v56 = vrot.slane %v5966_v58, 1 }
 0x23d   : > { %v5974_v34 = vadd.f32 %v2966_v45, %v5836_v26  ;;  %v3116_v28 = vsel %vm3071_vm11, %v6475_v31, %v6474_v22  ;;  %v3212_v26 = vsel %vm3167_vm0, %v6477_v33, %v6476_v18  ;;  %v3117_v22 = vrot.slane %v5966_v58, 7 }
 0x23e   : > { %3539 = vrot.lane.b32.xlu1 %v3466_v20, %s4573_s13  ;;  %3545 = vrot.lane.b32.xlu0 %v3194_v43, %s4573_s13  ;;  %v4543_v25 = vpop.f32.mrf.mxu0  ;;  %v3277_v43 = vmul.f32 %v6596_v52, %v3096_v4  ;;  %v5995_v49 = vmul.f32 %v6597_v23, %v3116_v28  ;;  %vm5999_vm5 = vcmp.le.s32.totalorder %v6598_v17, 14  ;;  %v6006_v18 = vadd.f32 %v4540_v15, %v5832_v63  ;;  %v6601_v28 = vld [vmem:[#allocation24_spill] sm:$0xff] }
 0x23f   : > { %v6478_v45 = vrot.slane %v5974_v34, 7  ;;  %v6009_v20 = vmul.f32 %v5650_v5, %v3212_v26  ;;  %v3195_v23 = vrot.slane %v5943_v59, 1  ;;  %v3468_v52 = vmul.f32 %v6601_v28, %v3192_v2 }
 0x240   : > { %v2976_v33 = vpop.f32.mrf.mxu0  ;;  %v3197_v17 = vrot.slane %v5934_v50, 1  ;;  %v6020_v31 = vadd.f32 %v5817_v42, %v5801_v32  ;;  %v6481_v26 = vrot.slane %v6006_v18, 7 }
 0x241   : > { %v6013_v4 = vadd.f32 %v2976_v33, %v5854_v19  ;;  %v3120_v63 = vsel %vm3071_vm11, %v3117_v22, %v6478_v45  ;;  %v6602_v19 = vrot.slane %v5974_v34, 1  ;;  %v3100_v33 = vsel %vm3071_vm11, %v3097_v41, %v3099_v3 }
 0x242   : > { %3355 = vrot.lane.b32.xlu1 %v3098_v10, %s4572_s12  ;;  %3353 = vrot.lane.b32.xlu0 %v3277_v43, %s4572_s12  ;;  %v4546_v5 = vpop.f32.mrf.mxu0  ;;  %v6038_v2 = vmul.f32 %v5663_v13, %v3120_v63  ;;  %v6486_v43 = vrot.slane %v6006_v18, 1  ;;  %v6043_v10 = vadd.f32 %v4543_v25, %v5850_v8  ;;  %v3198_v41 = vsel %vm3167_vm0, %v3195_v23, %v3197_v17  ;;  %v6605_v25 = vld [vmem:[#allocation27_spill] sm:$0xff] }
 0x243   : > { %v3216_v15 = vsel %vm3167_vm0, %v6603_v56, %v6602_v19  ;;  %v6479_v32 = vrot.slane %v6013_v4, 7  ;;  %v6480_v42 = vrot.slane %v6013_v4, 1  ;;  %v6604_v13 = vrot.slane %v5934_v50, 7 }
 0x244   : > { %v2986_v28 = vpop.f32.mrf.mxu0  ;;  %v6046_v45 = vmul.f32 %v5693_v39, %v3216_v15  ;;  %v3196_v56 = vsel %vm3167_vm0, %v3193_v40, %v3195_v23  ;;  %v3103_v8 = vrot.slane %v6020_v31, 7 }
 0x245   : > { %v6049_v19 = vadd.f32 %v2986_v28, %v5868_v61  ;;  %v3102_v63 = vsel %vm3071_vm11, %v3099_v3, %v6604_v13  ;;  %v3279_v61 = vmul.f32 %v6605_v25, %v3100_v33  ;;  %v3124_v15 = vsel %vm3071_vm11, %v6481_v26, %v6479_v32 }
 0x246   : > { %3543 = vrot.lane.b32.xlu1 %v3468_v52, %s4573_s13  ;;  %3549 = vrot.lane.b32.xlu0 %v3198_v41, %s4573_s13  ;;  %v4549_v39 = vpop.f32.mrf.mxu0  ;;  %v3220_v40 = vsel %vm3167_vm0, %v6486_v43, %v6480_v42  ;;  %v6078_v33 = vmul.f32 %v5720_v48, %v3124_v15  ;;  %v6484_v28 = vrot.slane %v6043_v10, 7  ;;  %v6485_v41 = vrot.slane %v6043_v10, 1 }
 0x247   : > { %v6482_v3 = vrot.slane %v6049_v19, 7  ;;  %v6483_v23 = vrot.slane %v6049_v19, 1  ;;  %v6075_v52 = vadd.f32 %v4549_v39, %v5875_v30  ;;  %v6083_v13 = vadd.f32 %v4546_v5, %v5857_v0  ;;  %v6606_v39 = vld [vmem:[#allocation28_spill] sm:$0xff] }
 0x248   : > { %v2996_v25 = vpop.f32.mrf.mxu0  ;;  %v6086_v32 = vmul.f32 %v5725_v29, %v3220_v40  ;;  %v3199_v42 = vrot.slane %v6020_v31, 1  ;;  %v3470_v0 = vmul.f32 %v6606_v39, %v3196_v56  ;;  %v6607_v39 = vld [vmem:[#allocation26_spill] sm:$0xff] }
 0x249   : > { %v6487_v26 = vrot.slane %v6075_v52, 7  ;;  %v3229_v30 = vrot.slane %v6075_v52, 1  ;;  %v6092_v48 = vadd.f32 %v2996_v25, %v5878_v16  ;;  %v3128_v29 = vsel %vm3071_vm11, %v6484_v28, %v6482_v3 }
 0x24a   : > { %3359 = vrot.lane.b32.xlu1 %v3102_v63, %s4572_s12  ;;  %3357 = vrot.lane.b32.xlu0 %v3279_v61, %s4572_s12  ;;  %v3224_v5 = vsel %vm3167_vm0, %v6485_v41, %v6483_v23  ;;  %v3960_v16 = vsel %vm5999_vm5, 1.0, %v6510_v7  ;;  %v3293_v61 = vmul.f32 %v5730_v21, %v3128_v29  ;;  %v3129_v40 = vrot.slane %v6083_v13, 7 }
 0x24b   : > { %v3131_v63 = vrot.slane %v6092_v48, 7  ;;  %v3227_v56 = vrot.slane %v6092_v48, 1  ;;  %v3484_v15 = vmul.f32 %v5747_v6, %v3224_v5  ;;  %v3225_v25 = vrot.slane %v6083_v13, 1 }
 0x24c   : > { %v6608_v3 = vrot.slane %v6607_v39, 7  ;;  %v6609_v44 = vrot.slane %v6607_v39, 1  ;;  %v6610_v21 = vrot.slane %v5861_v24, 1  ;;  %v6611_v29 = vrot.slane %v5934_v50, 7 }
 0x24e   : > { %v3166_v23 = vsel %vm3071_vm11, %v6487_v26, %v6608_v3  ;;  %v3264_v28 = vsel %vm3167_vm0, %v3229_v30, %v6609_v44  ;;  %v3202_v6 = vsel %vm3167_vm0, %v3199_v42, %v6610_v21  ;;  %v3104_v5 = vsel %vm3071_vm11, %v6611_v29, %v3103_v8  ;;  %3547 = vrot.lane.b32.xlu1 %v3470_v0, %s4573_s13  ;;  %v6612_v3 = vld [vmem:[#allocation25_spill] sm:$0xff] }
 0x24f   : > { %v3265_v41 = vmul.f32 %v5752_v11, %v3166_v23  ;;  %v6134_v43 = vmul.f32 %v5757_v12, %v3264_v28  ;;  %3553 = vrot.lane.b32.xlu0 %v3202_v6, %s4573_s13  ;;  %v6613_v26 = vand.u32 15, %v6612_v3  ;;  %v3132_v44 = vsel %vm3071_vm11, %v3129_v40, %v3131_v63  ;;  %v6614_v12 = vld [vmem:[#allocation30_spill] sm:$0xff] }
 0x250   : > { %v3228_v21 = vsel %vm3167_vm0, %v3225_v25, %v3227_v56  ;;  %v3295_v11 = vmul.f32 %v5846_v60, %v3132_v44  ;;  %v3281_v28 = vmul.f32 %v6614_v12, %v3104_v5  ;;  %v6615_v0 = vrot.slane %v5861_v24, 7 }
 0x251   : > { %vm953_vm6 = vcmp.le.s32.totalorder %v6613_v26, 14  ;;  %v6147_v23 = vmul.f32 %v3960_v16, %v3228_v21  ;;  %v3200_v29 = vsel %vm3167_vm0, %v3197_v17, %v3199_v42  ;;  %v6616_v60 = vrot.slane %v5892_v46, 1 }
 0x252   : > { %v3106_v6 = vsel %vm3071_vm11, %v3103_v8, %v6615_v0  ;;  %v3953_v26 = vsel %vm953_vm6, 1.0, %v6510_v7  ;;  %v6617_v16 = vrot.slane %v5871_v55, 1  ;;  %v6618_v7 = vrot.slane %v5892_v46, 7 }
 0x253   : > { %3363 = vrot.lane.b32.xlu1 %v3106_v6, %s4572_s12  ;;  %3361 = vrot.lane.b32.xlu0 %v3281_v28, %s4572_s12  ;;  %v3472_v3 = vmul.f32 %v3953_v26, %v3200_v29  ;;  %v6619_v8 = vrot.slane %v5871_v55, 7  ;;  %v6620_v42 = vrot.slane %v5926_v47, 1  ;;  %v6621_v44 = vrot.slane %v5899_v1, 1 }
 0x254   : > { %v3206_v5 = vsel %vm3167_vm0, %v6617_v16, %v6616_v60  ;;  %v6622_v12 = vrot.slane %v5926_v47, 7  ;;  %v6623_v28 = vrot.slane %v5899_v1, 7  ;;  %v6625_v6 = vrot.slane %v5937_v57, 1 }
 0x255   : > { %v3110_v17 = vsel %vm3071_vm11, %v6619_v8, %v6618_v7  ;;  %v3210_v21 = vsel %vm3167_vm0, %v6621_v44, %v6620_v42  ;;  %v6634_v8 = vrot.slane %v6013_v4, 7  ;;  %v6636_v44 = vrot.slane %v6049_v19, 7 }
 0x256   : > { %v3114_v0 = vsel %vm3071_vm11, %v6623_v28, %v6622_v12  ;;  %v3230_v12 = vsel %vm3167_vm0, %v3227_v56, %v3229_v30  ;;  %v6638_v28 = vld [vmem:[#allocation31_spill] sm:$0xff] }
 0x257   : > { %3551 = vrot.lane.b32.xlu1 %v3472_v3, %s4573_s13  ;;  %3557 = vrot.lane.b32.xlu0 %v3206_v5, %s4573_s13  ;;  %v6628_v3 = vrot.slane %v5974_v34, 1  ;;  %v6632_v5 = vrot.slane %v6013_v4, 1  ;;  %v6639_v30 = vld [vmem:[#allocation23_spill] sm:$0xff] }
 0x25b   : > { %3367 = vrot.lane.b32.xlu1 %v3110_v17, %s4572_s12  ;;  %3365 = vrot.lane.b32.xlu0 %v5921_v38, %s4572_s12  ;;  %v6624_v38 = vrot.slane %v5966_v58, 1 }
 0x25d   : > { %v3214_v26 = vsel %vm3167_vm0, %v6625_v6, %v6624_v38 }
 0x25f   : > { %3555 = vrot.lane.b32.xlu1 %v5929_v53, %s4573_s13  ;;  %3561 = vrot.lane.b32.xlu0 %v3210_v21, %s4573_s13  ;;  %v6626_v53 = vrot.slane %v5937_v57, 7  ;;  %v3130_v21 = vsel %vm3071_vm11, %v6636_v44, %v3129_v40  ;;  %v6637_v40 = vrot.slane %v6075_v52, 7 }
 0x261   : > { %v3118_v29 = vsel %vm3071_vm11, %v6626_v53, %v3117_v22  ;;  %v6630_v22 = vrot.slane %v5974_v34, 7 }
 0x263   : > { %3371 = vrot.lane.b32.xlu1 %v3114_v0, %s4572_s12  ;;  %3369 = vrot.lane.b32.xlu0 %v5961_v35, %s4572_s12  ;;  %v6627_v35 = vrot.slane %v6006_v18, 1 }
 0x265   : > { %v3218_v60 = vsel %vm3167_vm0, %v6628_v3, %v6627_v35 }
 0x267   : > { %3559 = vrot.lane.b32.xlu1 %v5969_v54, %s4573_s13  ;;  %3565 = vrot.lane.b32.xlu0 %v3214_v26, %s4573_s13  ;;  %v6629_v54 = vrot.slane %v6006_v18, 7 }
 0x269   : > { %v3122_v16 = vsel %vm3071_vm11, %v6630_v22, %v6629_v54 }
 0x26b   : > { %3375 = vrot.lane.b32.xlu1 %v3118_v29, %s4572_s12  ;;  %3373 = vrot.lane.b32.xlu0 %v5995_v49, %s4572_s12  ;;  %v6631_v49 = vrot.slane %v6043_v10, 1 }
 0x26d   : > { %v3222_v7 = vsel %vm3167_vm0, %v6632_v5, %v6631_v49 }
 0x26f   : > { %3563 = vrot.lane.b32.xlu1 %v6009_v20, %s4573_s13  ;;  %3569 = vrot.lane.b32.xlu0 %v3218_v60, %s4573_s13  ;;  %v6633_v20 = vrot.slane %v6043_v10, 7  ;;  %v6640_v60 = vld [vmem:[#allocation35_spill] sm:$0xff] }
 0x271   : > { %v3126_v17 = vsel %vm3071_vm11, %v6634_v8, %v6633_v20 }
 0x273   : > { %3379 = vrot.lane.b32.xlu1 %v3122_v16, %s4572_s12  ;;  %3377 = vrot.lane.b32.xlu0 %v6038_v2, %s4572_s12  ;;  %v6635_v2 = vrot.slane %v6049_v19, 1 }
 0x275   : > { %v3226_v42 = vsel %vm3167_vm0, %v6635_v2, %v3225_v25 }
 0x277   : > { %3567 = vrot.lane.b32.xlu1 %v6046_v45, %s4573_s13  ;;  %3573 = vrot.lane.b32.xlu0 %v3222_v7, %s4573_s13  ;;  %v6244_v45 = vpop.permute.xlu0 %3654 }
 0x27b   : > { %3383 = vrot.lane.b32.xlu1 %v3126_v17, %s4572_s12  ;;  %3381 = vrot.lane.b32.xlu0 %v6078_v33, %s4572_s12 }
 0x27f   : > { %3571 = vrot.lane.b32.xlu1 %v6086_v32, %s4573_s13  ;;  %3577 = vrot.lane.b32.xlu0 %v3226_v42, %s4573_s13 }
 0x283   : > { %3387 = vrot.lane.b32.xlu1 %v3130_v21, %s4572_s12  ;;  %3385 = vrot.lane.b32.xlu0 %v3293_v61, %s4572_s12  ;;  %v3133_v61 = vsel %vm3071_vm11, %v3131_v63, %v6637_v40  ;;  %vm3817_vm11 = vcmask 31744  }
 0x284   : > { %v3332_v33 = vpop.permute.xlu0 %3331 }
 0x285   : > { %v3426_v56 = vadd.f32 %v3332_v33, %v6639_v30 }
 0x287   : > { %3575 = vrot.lane.b32.xlu1 %v3484_v15, %s4573_s13  ;;  %3329 = vrot.lane.b32.xlu0 %v3265_v41, %s4572_s12 }
 0x288   : > { %v6253_v25 = vpop.permute.xlu0 %3521  ;;  %v3336_v32 = vpop.permute.xlu1 %3335 }
 0x28b   : > { %3581 = vrot.lane.b32.xlu0 %v3230_v12, %s4573_s13  ;;  %3391 = vrot.lane.b32.xlu1 %v3133_v61, %s4572_s12 }
 0x28c   : > { %v3526_v41 = vpop.permute.xlu0 %3525  ;;  %v3334_v15 = vpop.permute.xlu1 %3333 }
 0x28d   : > { %v3427_v0 = vadd.f32 %v3334_v15, %v6638_v28 }
 0x28f   : > { %3583 = vrot.lane.b32.xlu1 %v6134_v43, %s4573_s13  ;;  %3389 = vrot.lane.b32.xlu0 %v3295_v11, %s4572_s12  ;;  %v3619_v38 = vadd.f32 %v3526_v41, %v3427_v0  ;;  %v6641_v43 = vld [vmem:[#allocation29_spill] sm:$0xff] }
 0x290   : > { %v3524_v6 = vpop.permute.xlu1 %3523  ;;  %v3530_v26 = vpop.permute.xlu0 %3529  ;;  %v3428_v11 = vadd.f32 %v3336_v32, %v6641_v43 }
 0x291   : > { %v3618_v53 = vadd.f32 %v3524_v6, %v3426_v56  ;;  %v3659_v3 = vadd.f32 %v6244_v45, %v3619_v38 }
 0x293   : > { %3579 = vrot.lane.b32.xlu1 %v6147_v23, %s4573_s13  ;;  %v3658_v63 = vadd.f32 %v6244_v45, %v3618_v53 }
 0x294   : > { %v3340_v29 = vpop.permute.xlu1 %3339  ;;  %v3338_v35 = vpop.permute.xlu0 %3337 }
 0x295   : > { %v3429_v54 = vadd.f32 %v3338_v35, %v6640_v60  ;;  %3723 = vrot.lane.b32.xlu0 %v3658_v63, %s4573_s13  ;;  %v3430_v2 = vadd.f32 %v3340_v29, %v5600_v36 }
 0x297   : > { %3725 = vrot.lane.b32.xlu1 %v3659_v3, %s4573_s13  ;;  %v3621_v22 = vadd.f32 %v3530_v26, %v3429_v54 }
 0x298   : > { %v3528_v16 = vpop.permute.xlu1 %3527  ;;  %v3534_v49 = vpop.permute.xlu0 %3533 }
 0x299   : > { %v3620_v5 = vadd.f32 %v3528_v16, %v3428_v11  ;;  %v3661_v23 = vadd.f32 %v6244_v45, %v3621_v22 }
 0x29b   : > { %v3660_v7 = vadd.f32 %v6244_v45, %v3620_v5  ;;  %3729 = vrot.lane.b32.xlu1 %v3661_v23, %s4573_s13 }
 0x29c   : > { %v3344_v20 = vpop.permute.xlu1 %3343  ;;  %v3342_v8 = vpop.permute.xlu0 %3341 }
 0x29d   : > { %v3431_v17 = vadd.f32 %v3342_v8, %v5637_v9  ;;  %3727 = vrot.lane.b32.xlu0 %v3660_v7, %s4573_s13  ;;  %v3432_v9 = vadd.f32 %v3344_v20, %v5658_v62 }
 0x29f   : > { %v3623_v42 = vadd.f32 %v3534_v49, %v3431_v17 }
 0x2a0   : > { %v3532_v44 = vpop.permute.xlu1 %3531  ;;  %v3538_v21 = vpop.permute.xlu0 %3537 }
 0x2a1   : > { %v3622_v33 = vadd.f32 %v3532_v44, %v3430_v2  ;;  %v3663_v32 = vadd.f32 %v6244_v45, %v3623_v42 }
 0x2a3   : > { %v3662_v12 = vadd.f32 %v6244_v45, %v3622_v33  ;;  %3733 = vrot.lane.b32.xlu1 %v3663_v32, %s4573_s13 }
 0x2a4   : > { %v3348_v40 = vpop.permute.xlu1 %3347  ;;  %v3346_v61 = vpop.permute.xlu0 %3345 }
 0x2a5   : > { %v3433_v41 = vadd.f32 %v3346_v61, %v5734_v37  ;;  %3731 = vrot.lane.b32.xlu0 %v3662_v12, %s4573_s13  ;;  %v6642_v37 = vld [vmem:[#allocation39_spill] sm:$0xff] }
 0x2a6   : > { %v3434_v53 = vadd.f32 %v3348_v40, %v6642_v37 }
 0x2a7   : > { %v3625_v15 = vadd.f32 %v3538_v21, %v3433_v41 }
 0x2a8   : > { %v3536_v36 = vpop.permute.xlu1 %3535  ;;  %v3542_v28 = vpop.permute.xlu0 %3541 }
 0x2a9   : > { %v3624_v0 = vadd.f32 %v3536_v36, %v3432_v9  ;;  %v3665_v30 = vadd.f32 %v6244_v45, %v3625_v15 }
 0x2ab   : > { %v3664_v56 = vadd.f32 %v6244_v45, %v3624_v0  ;;  %3737 = vrot.lane.b32.xlu1 %v3665_v30, %s4573_s13 }
 0x2ac   : > { %v3352_v38 = vpop.permute.xlu1 %3351  ;;  %v3350_v6 = vpop.permute.xlu0 %3349 }
 0x2ad   : > { %v3435_v26 = vadd.f32 %v3350_v6, %v5815_v14  ;;  %3735 = vrot.lane.b32.xlu0 %v3664_v56, %s4573_s13  ;;  %v6643_v14 = vld [vmem:[#allocation3_spill] sm:$0xff] }
 0x2ae   : > { %v3436_v22 = vadd.f32 %v3352_v38, %v6643_v14 }
 0x2af   : > { %v3627_v63 = vadd.f32 %v3542_v28, %v3435_v26 }
 0x2b0   : > { %v3540_v62 = vpop.permute.xlu1 %3539  ;;  %v3546_v29 = vpop.permute.xlu0 %3545 }
 0x2b1   : > { %v3626_v35 = vadd.f32 %v3540_v62, %v3434_v53  ;;  %v3667_v3 = vadd.f32 %v6244_v45, %v3627_v63 }
 0x2b3   : > { %v3666_v60 = vadd.f32 %v6244_v45, %v3626_v35  ;;  %3741 = vrot.lane.b32.xlu1 %v3667_v3, %s4573_s13 }
 0x2b4   : > { %v3356_v54 = vpop.permute.xlu1 %3355  ;;  %v3354_v43 = vpop.permute.xlu0 %3353 }
 0x2b5   : > { %v3437_v11 = vadd.f32 %v3354_v43, %v5882_v51  ;;  %3739 = vrot.lane.b32.xlu0 %v3666_v60, %s4573_s13  ;;  %v3438_v51 = vadd.f32 %v3356_v54, %v5897_v27 }
 0x2b7   : > { %v3629_v16 = vadd.f32 %v3546_v29, %v3437_v11 }
 0x2b8   : > { %v3544_v49 = vpop.permute.xlu1 %3543  ;;  %v3550_v5 = vpop.permute.xlu0 %3549 }
 0x2b9   : > { %v3628_v23 = vadd.f32 %v3544_v49, %v3436_v22  ;;  %v3669_v7 = vadd.f32 %v6244_v45, %v3629_v16 }
 0x2bb   : > { %v3668_v20 = vadd.f32 %v6244_v45, %v3628_v23  ;;  %3745 = vrot.lane.b32.xlu1 %v3669_v7, %s4573_s13 }
 0x2bc   : > { %v3360_v8 = vpop.permute.xlu1 %3359  ;;  %v3358_v17 = vpop.permute.xlu0 %3357 }
 0x2bd   : > { %v3439_v2 = vadd.f32 %v3358_v17, %v5943_v59  ;;  %3743 = vrot.lane.b32.xlu0 %v3668_v20, %s4573_s13  ;;  %v3440_v59 = vadd.f32 %v3360_v8, %v5934_v50 }
 0x2bf   : > { %v3631_v42 = vadd.f32 %v3550_v5, %v3439_v2 }
 0x2c0   : > { %v3548_v44 = vpop.permute.xlu1 %3547 }
 0x2c1   : > { %v3554_v21 = vpop.permute.xlu0 %3553  ;;  %v3630_v33 = vadd.f32 %v3548_v44, %v3438_v51  ;;  %v3671_v32 = vadd.f32 %v6244_v45, %v3631_v42 }
 0x2c3   : > { %v3670_v12 = vadd.f32 %v6244_v45, %v3630_v33  ;;  %3749 = vrot.lane.b32.xlu1 %v3671_v32, %s4573_s13 }
 0x2c5   : > { %v3364_v40 = vpop.permute.xlu1 %3363  ;;  %v3362_v61 = vpop.permute.xlu0 %3361  ;;  %3747 = vrot.lane.b32.xlu0 %v3670_v12, %s4573_s13 }
 0x2c6   : > { %v3441_v41 = vadd.f32 %v3362_v61, %v6020_v31  ;;  %v3442_v31 = vadd.f32 %v3364_v40, %v5861_v24 }
 0x2c8   : > { %v3633_v9 = vadd.f32 %v3554_v21, %v3441_v41 }
 0x2c9   : > { %v3552_v27 = vpop.permute.xlu1 %3551  ;;  %v3558_v15 = vpop.permute.xlu0 %3557 }
 0x2ca   : > { %v3632_v36 = vadd.f32 %v3552_v27, %v3440_v59  ;;  %v3673_v28 = vadd.f32 %v6244_v45, %v3633_v9 }
 0x2cc   : > { %v3672_v0 = vadd.f32 %v6244_v45, %v3632_v36  ;;  %3753 = vrot.lane.b32.xlu1 %v3673_v28, %s4573_s13 }
 0x2cd   : > { %v3368_v30 = vpop.permute.xlu1 %3367  ;;  %v3366_v56 = vpop.permute.xlu0 %3365 }
 0x2ce   : > { %v3443_v38 = vadd.f32 %v3366_v56, %v5871_v55  ;;  %3751 = vrot.lane.b32.xlu0 %v3672_v0, %s4573_s13  ;;  %v3444_v55 = vadd.f32 %v3368_v30, %v5892_v46 }
 0x2d0   : > { %v3635_v6 = vadd.f32 %v3558_v15, %v3443_v38 }
 0x2d1   : > { %v3556_v50 = vpop.permute.xlu1 %3555  ;;  %v3562_v26 = vpop.permute.xlu0 %3561 }
 0x2d2   : > { %v3634_v37 = vadd.f32 %v3556_v50, %v3442_v31  ;;  %v3675_v53 = vadd.f32 %v6244_v45, %v3635_v6 }
 0x2d4   : > { %v3674_v63 = vadd.f32 %v6244_v45, %v3634_v37  ;;  %3757 = vrot.lane.b32.xlu1 %v3675_v53, %s4573_s13 }
 0x2d5   : > { %v3372_v62 = vpop.permute.xlu1 %3371  ;;  %v3370_v29 = vpop.permute.xlu0 %3369 }
 0x2d6   : > { %v3445_v35 = vadd.f32 %v3370_v29, %v5899_v1  ;;  %3755 = vrot.lane.b32.xlu0 %v3674_v63, %s4573_s13  ;;  %v3446_v1 = vadd.f32 %v3372_v62, %v5926_v47 }
 0x2d8   : > { %v3637_v3 = vadd.f32 %v3562_v26, %v3445_v35 }
 0x2d9   : > { %v3560_v24 = vpop.permute.xlu1 %3559  ;;  %v3566_v60 = vpop.permute.xlu0 %3565 }
 0x2da   : > { %v3636_v54 = vadd.f32 %v3560_v24, %v3444_v55  ;;  %v3677_v43 = vadd.f32 %v6244_v45, %v3637_v3 }
 0x2dc   : > { %v3676_v11 = vadd.f32 %v6244_v45, %v3636_v54  ;;  %3761 = vrot.lane.b32.xlu1 %v3677_v43, %s4573_s13 }
 0x2dd   : > { %v3376_v14 = vpop.permute.xlu1 %3375  ;;  %v3374_v22 = vpop.permute.xlu0 %3373 }
 0x2de   : > { %v3447_v16 = vadd.f32 %v3374_v22, %v5937_v57  ;;  %3759 = vrot.lane.b32.xlu0 %v3676_v11, %s4573_s13  ;;  %v3448_v57 = vadd.f32 %v3376_v14, %v5966_v58 }
 0x2e0   : > { %v3639_v49 = vadd.f32 %v3566_v60, %v3447_v16 }
 0x2e1   : > { %v3564_v46 = vpop.permute.xlu1 %3563  ;;  %v3570_v5 = vpop.permute.xlu0 %3569 }
 0x2e2   : > { %v3638_v23 = vadd.f32 %v3564_v46, %v3446_v1  ;;  %v3679_v7 = vadd.f32 %v6244_v45, %v3639_v49 }
 0x2e4   : > { %v3678_v20 = vadd.f32 %v6244_v45, %v3638_v23  ;;  %3765 = vrot.lane.b32.xlu1 %v3679_v7, %s4573_s13 }
 0x2e5   : > { %v3380_v8 = vpop.permute.xlu1 %3379  ;;  %v3378_v17 = vpop.permute.xlu0 %3377 }
 0x2e6   : > { %v3449_v2 = vadd.f32 %v3378_v17, %v5974_v34  ;;  %3763 = vrot.lane.b32.xlu0 %v3678_v20, %s4573_s13  ;;  %v3450_v34 = vadd.f32 %v3380_v8, %v6006_v18 }
 0x2e8   : > { %v3641_v51 = vadd.f32 %v3570_v5, %v3449_v2 }
 0x2e9   : > { %v3568_v47 = vpop.permute.xlu1 %3567  ;;  %v3574_v42 = vpop.permute.xlu0 %3573 }
 0x2ea   : > { %v3640_v44 = vadd.f32 %v3568_v47, %v3448_v57  ;;  %v3681_v21 = vadd.f32 %v6244_v45, %v3641_v51 }
 0x2ec   : > { %v3680_v33 = vadd.f32 %v6244_v45, %v3640_v44  ;;  %3769 = vrot.lane.b32.xlu1 %v3681_v21, %s4573_s13 }
 0x2ed   : > { %v3384_v32 = vpop.permute.xlu1 %3383  ;;  %v3382_v12 = vpop.permute.xlu0 %3381 }
 0x2ee   : > { %v3451_v40 = vadd.f32 %v3382_v12, %v6013_v4  ;;  %3767 = vrot.lane.b32.xlu0 %v3680_v33, %s4573_s13  ;;  %v3452_v4 = vadd.f32 %v3384_v32, %v6043_v10 }
 0x2f0   : > { %v3643_v61 = vadd.f32 %v3574_v42, %v3451_v40 }
 0x2f1   : > { %v3572_v58 = vpop.permute.xlu1 %3571  ;;  %v3578_v41 = vpop.permute.xlu0 %3577 }
 0x2f2   : > { %v3642_v59 = vadd.f32 %v3572_v58, %v3450_v34  ;;  %v3683_v9 = vadd.f32 %v6244_v45, %v3643_v61 }
 0x2f4   : > { %v3682_v27 = vadd.f32 %v6244_v45, %v3642_v59  ;;  %3773 = vrot.lane.b32.xlu1 %v3683_v9, %s4573_s13 }
 0x2f5   : > { %v3388_v15 = vpop.permute.xlu1 %3387  ;;  %v3386_v36 = vpop.permute.xlu0 %3385 }
 0x2f6   : > { %v3453_v28 = vadd.f32 %v3386_v36, %v6049_v19  ;;  %3771 = vrot.lane.b32.xlu0 %v3682_v27, %s4573_s13  ;;  %v3454_v63 = vadd.f32 %v3388_v15, %v6083_v13 }
 0x2f8   : > { %v3645_v0 = vadd.f32 %v3578_v41, %v3453_v28 }
 0x2f9   : > { %v3576_v18 = vpop.permute.xlu1 %3575  ;;  %v3330_v30 = vpop.permute.xlu0 %3329 }
 0x2fa   : > { %v3644_v56 = vadd.f32 %v3576_v18, %v3452_v4  ;;  %v3425_v38 = vadd.f32 %v3330_v30, %v6607_v39  ;;  %v3685_v31 = vadd.f32 %v6244_v45, %v3645_v0 }
 0x2fc   : > { %v3684_v6 = vadd.f32 %v6244_v45, %v3644_v56  ;;  %v3617_v50 = vadd.f32 %v6253_v25, %v3425_v38  ;;  %3777 = vrot.lane.b32.xlu1 %v3685_v31, %s4573_s13 }
 0x2fd   : > { %v3582_v19 = vpop.permute.xlu0 %3581  ;;  %v3392_v26 = vpop.permute.xlu1 %3391 }
 0x2fe   : > { %3775 = vrot.lane.b32.xlu0 %v3684_v6, %s4573_s13  ;;  %v3657_v10 = vadd.f32 %v6244_v45, %v3617_v50  ;;  %v3456_v25 = vadd.f32 %v3392_v26, %v6075_v52 }
 0x300   : > { %3721 = vrot.lane.b32.xlu1 %v3657_v10, %s4573_s13 }
 0x301   : > { %v3584_v37 = vpop.permute.xlu1 %3583  ;;  %v3390_v53 = vpop.permute.xlu0 %3389 }
 0x302   : > { %v3455_v39 = vadd.f32 %v3390_v53, %v6092_v48  ;;  %v3648_v48 = vadd.f32 %v3584_v37, %v3456_v25 }
 0x304   : > { %v3647_v62 = vadd.f32 %v3582_v19, %v3455_v39  ;;  %v3688_v24 = vadd.f32 %v6244_v45, %v3648_v48 }
 0x305   : > { %v3580_v29 = vpop.permute.xlu1 %3579 }
 0x306   : > { %v3646_v35 = vadd.f32 %v3580_v29, %v3454_v63  ;;  %v3687_v55 = vadd.f32 %v6244_v45, %v3647_v62 }
 0x307   : > { %v3724_v52 = vpop.permute.xlu0 %3723 }
 0x308   : > { %v3686_v13 = vadd.f32 %v6244_v45, %v3646_v35  ;;  %3781 = vrot.lane.b32.xlu1 %v3687_v55, %s4573_s13  ;;  %3819 = vst.msk [vmem:[%s6368_s16 + $0x8] sm:$0xff] %vm3817_vm11, %v3724_v52 }
 0x309   : > { %v3726_v3 = vpop.permute.xlu1 %3725 }
 0x30a   : > { %3820 = vst.msk [vmem:[%s6368_s16 + $0x10] sm:$0xff] %vm3817_vm11, %v3726_v3  ;;  %3779 = vrot.lane.b32.xlu0 %v3686_v13, %s4573_s13 }
 0x30d   : > { %v3730_v60 = vpop.permute.xlu1 %3729 }
 0x30e   : > { %3783 = vrot.lane.b32.xlu0 %v3688_v24, %s4573_s13  ;;  %3822 = vst.msk [vmem:[%s6368_s16 + $0x20] sm:$0xff] %vm3817_vm11, %v3730_v60 }
 0x30f   : > { %v3728_v54 = vpop.permute.xlu0 %3727 }
 0x310   : > { %3821 = vst.msk [vmem:[%s6368_s16 + $0x18] sm:$0xff] %vm3817_vm11, %v3728_v54 }
 0x315   : > { %v3734_v43 = vpop.permute.xlu1 %3733 }
 0x316   : > { %3824 = vst.msk [vmem:[%s6368_s16 + $0x30] sm:$0xff] %vm3817_vm11, %v3734_v43 }
 0x317   : > { %v3732_v11 = vpop.permute.xlu0 %3731 }
 0x318   : > { %3823 = vst.msk [vmem:[%s6368_s16 + $0x28] sm:$0xff] %vm3817_vm11, %v3732_v11 }
 0x31d   : > { %v3738_v45 = vpop.permute.xlu1 %3737 }
 0x31e   : > { %3826 = vst.msk [vmem:[%s6368_s16 + $0x40] sm:$0xff] %vm3817_vm11, %v3738_v45 }
 0x31f   : > { %v3736_v14 = vpop.permute.xlu0 %3735 }
 0x320   : > { %3825 = vst.msk [vmem:[%s6368_s16 + $0x38] sm:$0xff] %vm3817_vm11, %v3736_v14 }
 0x325   : > { %v3742_v22 = vpop.permute.xlu1 %3741 }
 0x326   : > { %3828 = vst.msk [vmem:[%s6368_s16 + $0x50] sm:$0xff] %vm3817_vm11, %v3742_v22 }
 0x327   : > { %v3740_v16 = vpop.permute.xlu0 %3739 }
 0x328   : > { %3827 = vst.msk [vmem:[%s6368_s16 + $0x48] sm:$0xff] %vm3817_vm11, %v3740_v16 }
 0x32d   : > { %v3746_v1 = vpop.permute.xlu1 %3745 }
 0x32e   : > { %3830 = vst.msk [vmem:[%s6368_s16 + $0x60] sm:$0xff] %vm3817_vm11, %v3746_v1 }
 0x32f   : > { %v3744_v49 = vpop.permute.xlu0 %3743 }
 0x330   : > { %3829 = vst.msk [vmem:[%s6368_s16 + $0x58] sm:$0xff] %vm3817_vm11, %v3744_v49 }
 0x335   : > { %v3750_v46 = vpop.permute.xlu1 %3749 }
 0x336   : > { %3832 = vst.msk [vmem:[%s6368_s16 + $0x70] sm:$0xff] %vm3817_vm11, %v3750_v46 }
 0x337   : > { %v3748_v5 = vpop.permute.xlu0 %3747 }
 0x338   : > { %3831 = vst.msk [vmem:[%s6368_s16 + $0x68] sm:$0xff] %vm3817_vm11, %v3748_v5 }
 0x33e   : > { %v3754_v23 = vpop.permute.xlu1 %3753 }
 0x33f   : > { %3834 = vst.msk [vmem:[%s6368_s16 + $0x80] sm:$0xff] %vm3817_vm11, %v3754_v23 }
 0x340   : > { %v3752_v7 = vpop.permute.xlu0 %3751 }
 0x341   : > { %3833 = vst.msk [vmem:[%s6368_s16 + $0x78] sm:$0xff] %vm3817_vm11, %v3752_v7 }
 0x346   : > { %v3758_v20 = vpop.permute.xlu1 %3757 }
 0x347   : > { %3836 = vst.msk [vmem:[%s6368_s16 + $0x90] sm:$0xff] %vm3817_vm11, %v3758_v20 }
 0x348   : > { %v3756_v8 = vpop.permute.xlu0 %3755 }
 0x349   : > { %3835 = vst.msk [vmem:[%s6368_s16 + $0x88] sm:$0xff] %vm3817_vm11, %v3756_v8 }
 0x34e   : > { %v3762_v17 = vpop.permute.xlu1 %3761 }
 0x34f   : > { %3838 = vst.msk [vmem:[%s6368_s16 + $0xa0] sm:$0xff] %vm3817_vm11, %v3762_v17 }
 0x350   : > { %v3760_v2 = vpop.permute.xlu0 %3759 }
 0x351   : > { %3837 = vst.msk [vmem:[%s6368_s16 + $0x98] sm:$0xff] %vm3817_vm11, %v3760_v2 }
 0x356   : > { %v3766_v57 = vpop.permute.xlu1 %3765 }
 0x357   : > { %3840 = vst.msk [vmem:[%s6368_s16 + $0xb0] sm:$0xff] %vm3817_vm11, %v3766_v57 }
 0x358   : > { %v3764_v51 = vpop.permute.xlu0 %3763 }
 0x359   : > { %3839 = vst.msk [vmem:[%s6368_s16 + $0xa8] sm:$0xff] %vm3817_vm11, %v3764_v51 }
 0x35e   : > { %v3770_v47 = vpop.permute.xlu1 %3769 }
 0x35f   : > { %3842 = vst.msk [vmem:[%s6368_s16 + $0xc0] sm:$0xff] %vm3817_vm11, %v3770_v47 }
 0x360   : > { %v3768_v42 = vpop.permute.xlu0 %3767 }
 0x361   : > { %3841 = vst.msk [vmem:[%s6368_s16 + $0xb8] sm:$0xff] %vm3817_vm11, %v3768_v42 }
 0x366   : > { %v3774_v44 = vpop.permute.xlu1 %3773 }
 0x367   : > { %3844 = vst.msk [vmem:[%s6368_s16 + $0xd0] sm:$0xff] %vm3817_vm11, %v3774_v44 }
 0x368   : > { %v3772_v21 = vpop.permute.xlu0 %3771 }
 0x369   : > { %3843 = vst.msk [vmem:[%s6368_s16 + $0xc8] sm:$0xff] %vm3817_vm11, %v3772_v21 }
 0x36e   : > { %v3778_v33 = vpop.permute.xlu1 %3777 }
 0x36f   : > { %3846 = vst.msk [vmem:[%s6368_s16 + $0xe0] sm:$0xff] %vm3817_vm11, %v3778_v33 }
 0x370   : > { %v3776_v32 = vpop.permute.xlu0 %3775 }
 0x371   : > { %3845 = vst.msk [vmem:[%s6368_s16 + $0xd8] sm:$0xff] %vm3817_vm11, %v3776_v32 }
 0x372   : > { %v3722_v12 = vpop.permute.xlu1 %3721 }
 0x373   : > { %3818 = vst.msk [vmem:[%s6368_s16] sm:$0xff] %vm3817_vm11, %v3722_v12 }
 0x37a   : > { %v3782_v40 = vpop.permute.xlu1 %3781 }
 0x37b   : > { %3848 = vst.msk [vmem:[%s6368_s16 + $0xf0] sm:$0xff] %vm3817_vm11, %v3782_v40 }
 0x37c   : > { %v3780_v34 = vpop.permute.xlu0 %3779 }
 0x37d   : > { %3847 = vst.msk [vmem:[%s6368_s16 + $0xe8] sm:$0xff] %vm3817_vm11, %v3780_v34 }
 0x380   : > { %v3784_v61 = vpop.permute.xlu0 %3783 }
 0x381   : > { %3849 = vst.msk [vmem:[%s6368_s16 + $0xf8] sm:$0xff] %vm3817_vm11, %v3784_v61 }
 0x382 PF: > { %s21_s17 = sadd.s32 1, %s4569_s17  }
 0x383   : > { %p18_p4 = scmp.ge.s32.totalorder %s21_s17, 4  }
 0x385   :  { %20 = sbr.rel (!%p18_p4) target bundleno = 1 (0x1), region = 99 }

</bundles_post_ra>
